<compile_context>
chip_gen: v5e
topology: v5e:2x2
jax: 0.10.0
libtpu: 0.0.40
codegen_flags: <defaults>
</compile_context>

<pallas_src>
import functools

import jax
import jax.numpy as jnp
from jax.experimental import pallas as pl
from jax.experimental.pallas import tpu as pltpu


def _round_up(x, m):
    return ((x + m - 1) // m) * m


def _reorder_gates(w):
    """Permute the 4H gate axis (last dim) from PyTorch [i,f,g,o] to [i,f,o,g]."""
    i, f, g, o = jnp.split(w, 4, axis=-1)
    return jnp.concatenate([i, f, o, g], axis=-1)


def _pick_block_b(batch):
    """Lane-dim batch block size (multiple of 128 = vreg lane width).

    v6e (single TC, 256-wide MXU): BB=256 for large batches halves the number
    of serial grid repeats of the time loop.  v7x (2 TCs): BB=128 keeps >= 2
    "parallel" blocks whenever B > 128 so both TensorCores engage.  For
    B <= 128 one lane group is the minimum unit of vector work, so padding to
    128 costs nothing per-vreg.
    """
    try:
        kind = jax.devices()[0].device_kind.lower()
    except Exception:  # defensive: unknown backend -> safe default
        kind = ""
    if "v6" in kind and batch > 128:
        return 256
    return 128


def _lstm2_kernel(tmax_ref,                        # SMEM (nblk,) i32 (scalar prefetch)
                  x_ref, len_ref,
                  wih0_ref, whh0_ref, b0_ref,
                  w1_ref, b1_ref,
                  out_ref, g0_ref):
    """2-layer LSTM recurrence over one batch block, batch-in-lanes layout.

    x_ref:    (T, E, BB)   bf16  tanh(embedding), time-major, batch in lanes
    len_ref:  (1, BB)      i32   valid length per sequence
    wih0_ref: (4H, E)      bf16  layer-0 W_ih^T   (gate rows ordered [i,f,o,g])
    whh0_ref: (4H, H)      bf16  layer-0 W_hh^T
    b0_ref:   (4H, 1)      f32   layer-0 combined bias
    w1_ref:   (4H, 2H)     bf16  layer-1 [W_ih^T | W_hh^T]
    b1_ref:   (4H, 1)      f32   layer-1 combined bias
    out_ref:  (2H, BB)     f32   rows [:H] = final c layer-0, rows [H:] = layer-1
    g0_ref:   (T, 4H, BB)  bf16  VMEM scratch: hoisted layer-0 input projection
    """
    BB = x_ref.shape[-1]
    H = whh0_ref.shape[1]

    # Per-block max valid length (scalar-prefetched): skip fully padded steps.
    t_hi = tmax_ref[pl.program_id(0)]

    lens = len_ref[...]                                  # (1, BB) i32
    wih0 = wih0_ref[...]                                 # (4H, E)  bf16
    whh0 = whh0_ref[...]                                 # (4H, H)  bf16
    w1 = w1_ref[...]                                     # (4H, 2H) bf16
    b0b = jnp.broadcast_to(b0_ref[...], (4 * H, BB))     # hoisted lane-broadcasts
    b1b = jnp.broadcast_to(b1_ref[...], (4 * H, BB))

    # ---- Hoisted layer-0 input projection (bias folded, bf16 scratch). ----
    @pl.loop(0, t_hi)
    def _(t):
        g = jnp.dot(wih0, x_ref[t], preferred_element_type=jnp.float32) + b0b
        g0_ref[t] = g.astype(jnp.bfloat16)

    def activate(gates, c):
        # Gate rows [i, f, o | g]: activations act on contiguous sublane ranges.
        sig = jax.nn.sigmoid(gates[:3 * H, :])
        g_g = jnp.tanh(gates[3 * H:, :])
        i_g = sig[0 * H:1 * H, :]
        f_g = sig[1 * H:2 * H, :]
        o_g = sig[2 * H:3 * H, :]
        c_new = f_g * c + i_g * g_g
        h_new = o_g * jnp.tanh(c_new)
        return h_new, c_new

    def cell0(t, h0, c0):
        # Input projection already in g0_ref; only the recurrent dot remains.
        gates = g0_ref[t].astype(jnp.float32) + jnp.dot(
            whh0, h0.astype(jnp.bfloat16), preferred_element_type=jnp.float32)
        h_new, c_new = activate(gates, c0)
        valid = lens > t                                 # (1, BB) packed-seq mask
        return jnp.where(valid, h_new, h0), jnp.where(valid, c_new, c0)

    def cell1(t, h0_in, h1, c1):
        # Layer-1 LHS: layout-free sublane stack of h0 / h1 (H % 8 == 0).
        hh = jnp.concatenate(
            [h0_in.astype(jnp.bfloat16), h1.astype(jnp.bfloat16)], axis=0)
        gates = jnp.dot(w1, hh, preferred_element_type=jnp.float32) + b1b
        h_new, c_new = activate(gates, c1)
        valid = lens > t
        return jnp.where(valid, h_new, h1), jnp.where(valid, c_new, c1)

    zeros = jnp.zeros((H, BB), jnp.float32)

    # Layers retimed by one step: iteration t runs layer-1 step t-1 and
    # layer-0 step t; both read only the carry, so their chains overlap.
    h0, c0 = cell0(0, zeros, zeros)                      # prologue: layer-0 @ t=0

    def step(t, carry):
        h0, c0, h1, c1 = carry
        h1, c1 = cell1(t - 1, h0, h1, c1)                # layer-1 @ t-1
        h0, c0 = cell0(t, h0, c0)                        # layer-0 @ t
        return h0, c0, h1, c1

    h0, c0, h1, c1 = jax.lax.fori_loop(1, t_hi, step, (h0, c0, zeros, zeros))
    h1, c1 = cell1(t_hi - 1, h0, h1, c1)                 # epilogue: layer-1 @ t_hi-1

    out_ref[:H, :] = c0
    out_ref[H:, :] = c1


def text_encoder_forward(tokens, txt_len, params):
    """tokens: (B, T) int32, txt_len: (B,) int -> (B, 2*text_dim) float32."""
    emb_table = params["embedding"]                      # (vocab, E)
    B, T = tokens.shape
    E = emb_table.shape[1]
    H = params["whh0"].shape[0]                          # whh0: (H, 4H)

    # Embedding gather + tanh are glue (plain JAX).  Batch-in-lanes layout
    # (T, E, B), handed to the kernel in bf16 (halves the dominant x DMA;
    # tanh applied in f32 first, so precision matches the old in-kernel path).
    emb = jnp.take(emb_table, tokens, axis=0)            # (B, T, E)
    x = jnp.transpose(jnp.tanh(emb.astype(jnp.float32)), (1, 2, 0))
    x = x.astype(jnp.bfloat16)                           # (T, E, B)

    BB = _pick_block_b(B)
    B_pad = _round_up(B, BB)
    lens = txt_len.astype(jnp.int32)
    if B_pad != B:
        x = jnp.pad(x, ((0, 0), (0, 0), (0, B_pad - B)))
        lens = jnp.pad(lens, (0, B_pad - B))             # padded rows: length 0
    nblk = B_pad // BB
    lens_row = lens.reshape(1, B_pad)
    # Per-block dynamic loop bound (scalar prefetch), clamped to [1, T].
    blk_tmax = jnp.clip(jnp.max(lens.reshape(nblk, BB), axis=1), 1, T).astype(jnp.int32)

    # Kernel-layout weights: gate columns [i,f,g,o] -> [i,f,o,g], transposed so
    # gates = W^T @ state; layer-1 input/recurrent weights stacked along K=2H;
    # MXU operands in bf16, biases in f32.
    wih0 = _reorder_gates(params["wih0"]).T.astype(jnp.bfloat16)           # (4H, E)
    whh0 = _reorder_gates(params["whh0"]).T.astype(jnp.bfloat16)           # (4H, H)
    b0 = _reorder_gates(params["b0"]).T.astype(jnp.float32)                # (4H, 1)
    w1 = _reorder_gates(
        jnp.concatenate([params["wih1"], params["whh1"]], axis=0)
    ).T.astype(jnp.bfloat16)                                               # (4H, 2H)
    b1 = _reorder_gates(params["b1"]).T.astype(jnp.float32)                # (4H, 1)

    out = pl.pallas_call(
        _lstm2_kernel,
        out_shape=jax.ShapeDtypeStruct((2 * H, B_pad), jnp.float32),
        grid_spec=pltpu.PrefetchScalarGridSpec(
            num_scalar_prefetch=1,
            grid=(nblk,),
            in_specs=[
                pl.BlockSpec((T, E, BB), lambda b, tmax: (0, 0, b)),       # x
                pl.BlockSpec((1, BB), lambda b, tmax: (0, b)),             # lens
                pl.BlockSpec((4 * H, E), lambda b, tmax: (0, 0)),          # W_ih0^T
                pl.BlockSpec((4 * H, H), lambda b, tmax: (0, 0)),          # W_hh0^T
                pl.BlockSpec((4 * H, 1), lambda b, tmax: (0, 0)),          # b0
                pl.BlockSpec((4 * H, 2 * H), lambda b, tmax: (0, 0)),      # W1^T
                pl.BlockSpec((4 * H, 1), lambda b, tmax: (0, 0)),          # b1
            ],
            out_specs=pl.BlockSpec((2 * H, BB), lambda b, tmax: (0, b)),   # lane-dense
            scratch_shapes=[pltpu.VMEM((T, 4 * H, BB), jnp.bfloat16)],
        ),
        compiler_params=pltpu.CompilerParams(
            dimension_semantics=("parallel",),
            vmem_limit_bytes=32 * 1024 * 1024),
    )(blk_tmax, x, lens_row, wih0, whh0, b0, w1, b1)

    # Back to (B, 2H).  Dropout (p=0.3) in eval mode is identity.
    return jnp.transpose(out)[:B]


def make_params(key, token_count, emb_dim, text_dim):
    """Deterministic synthetic parameters mirroring the PyTorch module shapes."""
    ks = jax.random.split(key, 9)
    H = text_dim
    bound = 1.0 / jnp.sqrt(jnp.float32(H))

    def u(k, shape):
        return jax.random.uniform(k, shape, jnp.float32, -bound, bound)

    # PyTorch shapes: W_ih_l0 (4H, E), W_hh_l0 (4H, H), biases (4H,), layer-1 input is H.
    w_ih0 = u(ks[0], (4 * H, emb_dim))
    w_hh0 = u(ks[1], (4 * H, H))
    b_ih0 = u(ks[2], (4 * H,))
    b_hh0 = u(ks[3], (4 * H,))
    w_ih1 = u(ks[4], (4 * H, H))
    w_hh1 = u(ks[5], (4 * H, H))
    b_ih1 = u(ks[6], (4 * H,))
    b_hh1 = u(ks[7], (4 * H,))
    embedding = jax.random.normal(ks[8], (token_count, emb_dim), jnp.float32)

    return {
        "embedding": embedding,
        "wih0": w_ih0.T,                                 # (E, 4H)  gate order [i,f,g,o]
        "whh0": w_hh0.T,                                 # (H, 4H)
        "b0": (b_ih0 + b_hh0)[None, :],                  # (1, 4H)
        "wih1": w_ih1.T,                                 # (H, 4H)
        "whh1": w_hh1.T,                                 # (H, 4H)
        "b1": (b_ih1 + b_hh1)[None, :],                  # (1, 4H)
    }


def _reference(tokens, txt_len, params):
    """Pure-JAX f32 reference (PyTorch semantics) for a correctness check."""
    emb = jnp.tanh(jnp.take(params["embedding"], tokens, axis=0))   # (B, T, E)
    x = jnp.transpose(emb, (1, 0, 2))                               # (T, B, E)
    B = tokens.shape[0]
    H = params["whh0"].shape[1] // 4
    lens = txt_len.astype(jnp.int32).reshape(B, 1)

    def cell(x_t, h, c, wih, whh, b):
        g = x_t @ wih + h @ whh + b
        i = jax.nn.sigmoid(g[:, :H])
        f = jax.nn.sigmoid(g[:, H:2 * H])
        gg = jnp.tanh(g[:, 2 * H:3 * H])
        o = jax.nn.sigmoid(g[:, 3 * H:])
        c_new = f * c + i * gg
        return o * jnp.tanh(c_new), c_new

    def step(carry, inp):
        t, x_t = inp
        h0, c0, h1, c1 = carry
        valid = lens > t
        h0n, c0n = cell(x_t, h0, c0, params["wih0"], params["whh0"], params["b0"])
        h0 = jnp.where(valid, h0n, h0)
        c0 = jnp.where(valid, c0n, c0)
        h1n, c1n = cell(h0, h1, c1, params["wih1"], params["whh1"], params["b1"])
        h1 = jnp.where(valid, h1n, h1)
        c1 = jnp.where(valid, c1n, c1)
        return (h0, c0, h1, c1), None

    z = jnp.zeros((B, H), jnp.float32)
    (h0, c0, h1, c1), _ = jax.lax.scan(
        step, (z, z, z, z), (jnp.arange(x.shape[0]), x))
    return jnp.concatenate([c0, c1], axis=1)


if __name__ == "__main__":
    # Small, module-consistent config.
    token_count = 50          # vocab size
    txt_embedding_dim = 32    # config.txt_embedding_dim
    text_dim = 32             # config.text_dim (LSTM hidden size)
    B, T = 2, 8

    key = jax.random.PRNGKey(0)
    k_tok, k_par = jax.random.split(key)

    tokens = jax.random.randint(k_tok, (B, T), 0, token_count, dtype=jnp.int32)
    txt_len = jnp.array([8, 5], dtype=jnp.int32)         # variable lengths (padded)

    params = make_params(k_par, token_count, txt_embedding_dim, text_dim)

    fwd = jax.jit(functools.partial(text_encoder_forward, params=params))
    out = fwd(tokens, txt_len)
    jax.block_until_ready(out)

    ref = _reference(tokens, txt_len, params)
    assert out.shape == (B, 2 * text_dim)
    # bf16 MXU operands / bf16 x / bf16 g0 scratch vs the f32 reference:
    # looser tolerance over the 8-step recurrence.
    assert jnp.allclose(out, ref, atol=4e-2, rtol=4e-2), "mismatch vs JAX reference"

    print("KERNEL_OK")
</pallas_src>

<mosaic_0001>
module attributes {stable_mosaic.version = 11 : i64} {
  func.func @_lstm2_kernel(%arg0: i32, %arg1: memref<1xi32, #tpu.memory_space<smem>>, %arg2: memref<8x32x128xbf16, #tpu.memory_space<vmem>>, %arg3: memref<1x128xi32, #tpu.memory_space<vmem>>, %arg4: memref<128x32xbf16, #tpu.memory_space<vmem>>, %arg5: memref<128x32xbf16, #tpu.memory_space<vmem>>, %arg6: memref<128x1xf32, #tpu.memory_space<vmem>>, %arg7: memref<128x64xbf16, #tpu.memory_space<vmem>>, %arg8: memref<128x1xf32, #tpu.memory_space<vmem>>, %arg9: memref<64x128xf32, #tpu.memory_space<vmem>>, %arg10: memref<8x128x128xbf16, #tpu.memory_space<vmem>>) attributes {dimension_semantics = [#tpu.dimension_semantics<parallel>], iteration_bounds = array<i64: 1>, scalar_prefetch = 1 : i64, scratch_operands = 1 : i64, tpu.core_type = #tpu.core_type<tc>, window_params = [{transform_indices = @transform_0, window_bounds = array<i64: 8, 32, 128>}, {transform_indices = @transform_1, window_bounds = array<i64: 1, 128>}, {pipeline_mode = #tpu.pipeline_mode<synchronous>, transform_indices = @transform_2, window_bounds = array<i64: 128, 32>}, {pipeline_mode = #tpu.pipeline_mode<synchronous>, transform_indices = @transform_3, window_bounds = array<i64: 128, 32>}, {pipeline_mode = #tpu.pipeline_mode<synchronous>, transform_indices = @transform_4, window_bounds = array<i64: 128, 1>}, {pipeline_mode = #tpu.pipeline_mode<synchronous>, transform_indices = @transform_5, window_bounds = array<i64: 128, 64>}, {pipeline_mode = #tpu.pipeline_mode<synchronous>, transform_indices = @transform_6, window_bounds = array<i64: 128, 1>}, {transform_indices = @transform_7, window_bounds = array<i64: 64, 128>}]} {
    %0 = arith.index_cast %arg0 : i32 to index
    %1 = memref.load %arg1[%0] : memref<1xi32, #tpu.memory_space<smem>>
    %c0 = arith.constant 0 : index
    %c0_0 = arith.constant 0 : index
    %2 = vector.load %arg3[%c0, %c0_0] : memref<1x128xi32, #tpu.memory_space<vmem>>, vector<1x128xi32>
    %c0_1 = arith.constant 0 : index
    %c0_2 = arith.constant 0 : index
    %3 = vector.load %arg4[%c0_1, %c0_2] : memref<128x32xbf16, #tpu.memory_space<vmem>>, vector<128x32xbf16>
    %c0_3 = arith.constant 0 : index
    %c0_4 = arith.constant 0 : index
    %4 = vector.load %arg5[%c0_3, %c0_4] : memref<128x32xbf16, #tpu.memory_space<vmem>>, vector<128x32xbf16>
    %c0_5 = arith.constant 0 : index
    %c0_6 = arith.constant 0 : index
    %5 = vector.load %arg7[%c0_5, %c0_6] : memref<128x64xbf16, #tpu.memory_space<vmem>>, vector<128x64xbf16>
    %c0_7 = arith.constant 0 : index
    %c0_8 = arith.constant 0 : index
    %6 = vector.load %arg6[%c0_7, %c0_8] : memref<128x1xf32, #tpu.memory_space<vmem>>, vector<128x1xf32>
    %7 = vector.shape_cast %6 : vector<128x1xf32> to vector<128x1xf32>
    %8 = vector.broadcast %7 : vector<128x1xf32> to vector<128x128xf32>
    %c0_9 = arith.constant 0 : index
    %c0_10 = arith.constant 0 : index
    %9 = vector.load %arg8[%c0_9, %c0_10] : memref<128x1xf32, #tpu.memory_space<vmem>>, vector<128x1xf32>
    %10 = vector.shape_cast %9 : vector<128x1xf32> to vector<128x1xf32>
    %11 = vector.broadcast %10 : vector<128x1xf32> to vector<128x128xf32>
    %c0_i32 = arith.constant 0 : i32
    %12 = arith.subi %1, %c0_i32 : i32
    %c1_i32 = arith.constant 1 : i32
    %c1_i32_11 = arith.constant 1 : i32
    %13 = arith.subi %c1_i32, %c1_i32_11 : i32
    %14 = arith.addi %12, %13 : i32
    %c1_i32_12 = arith.constant 1 : i32
    %15 = arith.divsi %14, %c1_i32_12 : i32
    %c1_i32_13 = arith.constant 1 : i32
    %c0_i32_14 = arith.constant 0 : i32
    %c0_i32_15 = arith.constant 0 : i32
    %16 = arith.subi %15, %c0_i32_15 : i32
    %17 = arith.addi %c0_i32_15, %16 : i32
    %c1_i32_16 = arith.constant 1 : i32
    scf.for %arg11 = %c0_i32_15 to %17 step %c1_i32_16  : i32 {
      %78 = arith.muli %arg11, %c1_i32_13 : i32
      %79 = arith.addi %c0_i32_14, %78 : i32
      %80 = arith.index_cast %79 : i32 to index
      %c0_31 = arith.constant 0 : index
      %c0_32 = arith.constant 0 : index
      %81 = vector.load %arg2[%80, %c0_31, %c0_32] : memref<8x32x128xbf16, #tpu.memory_space<vmem>>, vector<1x32x128xbf16>
      %82 = vector.shape_cast %81 : vector<1x32x128xbf16> to vector<32x128xbf16>
      %cst_33 = arith.constant dense<0.000000e+00> : vector<128x128xf32>
      %83 = tpu.matmul %3, %82, %cst_33 {dimension_numbers = #tpu.dot_dimension_numbers<[1], [0], [0], [1], [0, 0, 1, 1], [], []>} : vector<128x32xbf16>, vector<32x128xbf16>, vector<128x128xf32> -> vector<128x128xf32>
      %84 = arith.addf %83, %8 : vector<128x128xf32>
      %85 = arith.truncf %84 : vector<128x128xf32> to vector<128x128xbf16>
      %86 = arith.index_cast %79 : i32 to index
      %c0_34 = arith.constant 0 : index
      %c0_35 = arith.constant 0 : index
      %87 = vector.load %arg10[%86, %c0_34, %c0_35] : memref<8x128x128xbf16, #tpu.memory_space<vmem>>, vector<1x128x128xbf16>
      %88 = vector.shape_cast %87 : vector<1x128x128xbf16> to vector<128x128xbf16>
      %89 = vector.shape_cast %85 : vector<128x128xbf16> to vector<1x128x128xbf16>
      tpu.vector_store %arg10[%86, %c0_34, %c0_35], %89 {strides = array<i32>} : memref<8x128x128xbf16, #tpu.memory_space<vmem>>, vector<1x128x128xbf16>,
    }
    %cst = arith.constant 0.000000e+00 : f32
    %18 = vector.broadcast %cst : f32 to vector<32x128xf32>
    %c0_17 = arith.constant 0 : index
    %c0_18 = arith.constant 0 : index
    %c0_19 = arith.constant 0 : index
    %19 = vector.load %arg10[%c0_17, %c0_18, %c0_19] : memref<8x128x128xbf16, #tpu.memory_space<vmem>>, vector<1x128x128xbf16>
    %20 = vector.shape_cast %19 : vector<1x128x128xbf16> to vector<128x128xbf16>
    %21 = arith.extf %20 : vector<128x128xbf16> to vector<128x128xf32>
    %22 = arith.truncf %18 : vector<32x128xf32> to vector<32x128xbf16>
    %cst_20 = arith.constant dense<0.000000e+00> : vector<128x128xf32>
    %23 = tpu.matmul %4, %22, %cst_20 {dimension_numbers = #tpu.dot_dimension_numbers<[1], [0], [0], [1], [0, 0, 1, 1], [], []>} : vector<128x32xbf16>, vector<32x128xbf16>, vector<128x128xf32> -> vector<128x128xf32>
    %24 = arith.addf %21, %23 : vector<128x128xf32>
    %25 = vector.extract_strided_slice %24 {offsets = [0, 0], sizes = [96, 128], strides = [1, 1]} : vector<128x128xf32> to vector<96x128xf32>
    %26 = arith.negf %25 : vector<96x128xf32>
    %27 = math.exp %26 : vector<96x128xf32>
    %cst_21 = arith.constant 1.000000e+00 : f32
    %28 = vector.broadcast %cst_21 : f32 to vector<96x128xf32>
    %29 = arith.addf %28, %27 : vector<96x128xf32>
    %30 = arith.divf %28, %29 : vector<96x128xf32>
    %31 = vector.extract_strided_slice %24 {offsets = [96, 0], sizes = [32, 128], strides = [1, 1]} : vector<128x128xf32> to vector<32x128xf32>
    %32 = math.tanh %31 : vector<32x128xf32>
    %33 = vector.extract_strided_slice %30 {offsets = [0, 0], sizes = [32, 128], strides = [1, 1]} : vector<96x128xf32> to vector<32x128xf32>
    %34 = vector.extract_strided_slice %30 {offsets = [32, 0], sizes = [32, 128], strides = [1, 1]} : vector<96x128xf32> to vector<32x128xf32>
    %35 = vector.extract_strided_slice %30 {offsets = [64, 0], sizes = [32, 128], strides = [1, 1]} : vector<96x128xf32> to vector<32x128xf32>
    %36 = arith.mulf %34, %18 : vector<32x128xf32>
    %37 = arith.mulf %33, %32 : vector<32x128xf32>
    %38 = arith.addf %36, %37 : vector<32x128xf32>
    %39 = math.tanh %38 : vector<32x128xf32>
    %40 = arith.mulf %35, %39 : vector<32x128xf32>
    %c0_i32_22 = arith.constant 0 : i32
    %41 = vector.broadcast %c0_i32_22 : i32 to vector<1x128xi32>
    %42 = arith.cmpi sgt, %2, %41 : vector<1x128xi32>
    %43 = vector.shape_cast %42 : vector<1x128xi1> to vector<1x128xi1>
    %44 = vector.broadcast %43 : vector<1x128xi1> to vector<32x128xi1>
    %45 = arith.select %44, %40, %18 : vector<32x128xi1>, vector<32x128xf32>
    %46 = vector.shape_cast %42 : vector<1x128xi1> to vector<1x128xi1>
    %47 = vector.broadcast %46 : vector<1x128xi1> to vector<32x128xi1>
    %48 = arith.select %47, %38, %18 : vector<32x128xi1>, vector<32x128xf32>
    %c1_i32_23 = arith.constant 1 : i32
    %49 = arith.subi %1, %c1_i32_23 : i32
    %50 = arith.addi %c1_i32_23, %49 : i32
    %c1_i32_24 = arith.constant 1 : i32
    %51:4 = scf.for %arg11 = %c1_i32_23 to %50 step %c1_i32_24 iter_args(%arg12 = %45, %arg13 = %48, %arg14 = %18, %arg15 = %18) -> (vector<32x128xf32>, vector<32x128xf32>, vector<32x128xf32>, vector<32x128xf32>)  : i32 {
      %c1_i32_31 = arith.constant 1 : i32
      %78 = arith.subi %arg11, %c1_i32_31 : i32
      %79 = arith.truncf %arg12 : vector<32x128xf32> to vector<32x128xbf16>
      %80 = arith.truncf %arg14 : vector<32x128xf32> to vector<32x128xbf16>
      %81 = tpu.concatenate %79, %80 in 0 : vector<32x128xbf16>, vector<32x128xbf16> -> vector<64x128xbf16>
      %cst_32 = arith.constant dense<0.000000e+00> : vector<128x128xf32>
      %82 = tpu.matmul %5, %81, %cst_32 {dimension_numbers = #tpu.dot_dimension_numbers<[1], [0], [0], [1], [0, 0, 1, 1], [], []>} : vector<128x64xbf16>, vector<64x128xbf16>, vector<128x128xf32> -> vector<128x128xf32>
      %83 = arith.addf %82, %11 : vector<128x128xf32>
      %84 = vector.extract_strided_slice %83 {offsets = [0, 0], sizes = [96, 128], strides = [1, 1]} : vector<128x128xf32> to vector<96x128xf32>
      %85 = arith.negf %84 : vector<96x128xf32>
      %86 = math.exp %85 : vector<96x128xf32>
      %cst_33 = arith.constant 1.000000e+00 : f32
      %87 = vector.broadcast %cst_33 : f32 to vector<96x128xf32>
      %88 = arith.addf %87, %86 : vector<96x128xf32>
      %89 = arith.divf %87, %88 : vector<96x128xf32>
      %90 = vector.extract_strided_slice %83 {offsets = [96, 0], sizes = [32, 128], strides = [1, 1]} : vector<128x128xf32> to vector<32x128xf32>
      %91 = math.tanh %90 : vector<32x128xf32>
      %92 = vector.extract_strided_slice %89 {offsets = [0, 0], sizes = [32, 128], strides = [1, 1]} : vector<96x128xf32> to vector<32x128xf32>
      %93 = vector.extract_strided_slice %89 {offsets = [32, 0], sizes = [32, 128], strides = [1, 1]} : vector<96x128xf32> to vector<32x128xf32>
      %94 = vector.extract_strided_slice %89 {offsets = [64, 0], sizes = [32, 128], strides = [1, 1]} : vector<96x128xf32> to vector<32x128xf32>
      %95 = arith.mulf %93, %arg15 : vector<32x128xf32>
      %96 = arith.mulf %92, %91 : vector<32x128xf32>
      %97 = arith.addf %95, %96 : vector<32x128xf32>
      %98 = math.tanh %97 : vector<32x128xf32>
      %99 = arith.mulf %94, %98 : vector<32x128xf32>
      %100 = vector.broadcast %78 : i32 to vector<1x128xi32>
      %101 = arith.cmpi sgt, %2, %100 : vector<1x128xi32>
      %102 = vector.shape_cast %101 : vector<1x128xi1> to vector<1x128xi1>
      %103 = vector.broadcast %102 : vector<1x128xi1> to vector<32x128xi1>
      %104 = arith.select %103, %99, %arg14 : vector<32x128xi1>, vector<32x128xf32>
      %105 = vector.shape_cast %101 : vector<1x128xi1> to vector<1x128xi1>
      %106 = vector.broadcast %105 : vector<1x128xi1> to vector<32x128xi1>
      %107 = arith.select %106, %97, %arg15 : vector<32x128xi1>, vector<32x128xf32>
      %108 = arith.index_cast %arg11 : i32 to index
      %c0_34 = arith.constant 0 : index
      %c0_35 = arith.constant 0 : index
      %109 = vector.load %arg10[%108, %c0_34, %c0_35] : memref<8x128x128xbf16, #tpu.memory_space<vmem>>, vector<1x128x128xbf16>
      %110 = vector.shape_cast %109 : vector<1x128x128xbf16> to vector<128x128xbf16>
      %111 = arith.extf %110 : vector<128x128xbf16> to vector<128x128xf32>
      %112 = arith.truncf %arg12 : vector<32x128xf32> to vector<32x128xbf16>
      %cst_36 = arith.constant dense<0.000000e+00> : vector<128x128xf32>
      %113 = tpu.matmul %4, %112, %cst_36 {dimension_numbers = #tpu.dot_dimension_numbers<[1], [0], [0], [1], [0, 0, 1, 1], [], []>} : vector<128x32xbf16>, vector<32x128xbf16>, vector<128x128xf32> -> vector<128x128xf32>
      %114 = arith.addf %111, %113 : vector<128x128xf32>
      %115 = vector.extract_strided_slice %114 {offsets = [0, 0], sizes = [96, 128], strides = [1, 1]} : vector<128x128xf32> to vector<96x128xf32>
      %116 = arith.negf %115 : vector<96x128xf32>
      %117 = math.exp %116 : vector<96x128xf32>
      %cst_37 = arith.constant 1.000000e+00 : f32
      %118 = vector.broadcast %cst_37 : f32 to vector<96x128xf32>
      %119 = arith.addf %118, %117 : vector<96x128xf32>
      %120 = arith.divf %118, %119 : vector<96x128xf32>
      %121 = vector.extract_strided_slice %114 {offsets = [96, 0], sizes = [32, 128], strides = [1, 1]} : vector<128x128xf32> to vector<32x128xf32>
      %122 = math.tanh %121 : vector<32x128xf32>
      %123 = vector.extract_strided_slice %120 {offsets = [0, 0], sizes = [32, 128], strides = [1, 1]} : vector<96x128xf32> to vector<32x128xf32>
      %124 = vector.extract_strided_slice %120 {offsets = [32, 0], sizes = [32, 128], strides = [1, 1]} : vector<96x128xf32> to vector<32x128xf32>
      %125 = vector.extract_strided_slice %120 {offsets = [64, 0], sizes = [32, 128], strides = [1, 1]} : vector<96x128xf32> to vector<32x128xf32>
      %126 = arith.mulf %124, %arg13 : vector<32x128xf32>
      %127 = arith.mulf %123, %122 : vector<32x128xf32>
      %128 = arith.addf %126, %127 : vector<32x128xf32>
      %129 = math.tanh %128 : vector<32x128xf32>
      %130 = arith.mulf %125, %129 : vector<32x128xf32>
      %131 = vector.broadcast %arg11 : i32 to vector<1x128xi32>
      %132 = arith.cmpi sgt, %2, %131 : vector<1x128xi32>
      %133 = vector.shape_cast %132 : vector<1x128xi1> to vector<1x128xi1>
      %134 = vector.broadcast %133 : vector<1x128xi1> to vector<32x128xi1>
      %135 = arith.select %134, %130, %arg12 : vector<32x128xi1>, vector<32x128xf32>
      %136 = vector.shape_cast %132 : vector<1x128xi1> to vector<1x128xi1>
      %137 = vector.broadcast %136 : vector<1x128xi1> to vector<32x128xi1>
      %138 = arith.select %137, %128, %arg13 : vector<32x128xi1>, vector<32x128xf32>
      scf.yield %135, %138, %104, %107 : vector<32x128xf32>, vector<32x128xf32>, vector<32x128xf32>, vector<32x128xf32>
    }
    %c1_i32_25 = arith.constant 1 : i32
    %52 = arith.subi %1, %c1_i32_25 : i32
    %53 = arith.truncf %51#0 : vector<32x128xf32> to vector<32x128xbf16>
    %54 = arith.truncf %51#2 : vector<32x128xf32> to vector<32x128xbf16>
    %55 = tpu.concatenate %53, %54 in 0 : vector<32x128xbf16>, vector<32x128xbf16> -> vector<64x128xbf16>
    %cst_26 = arith.constant dense<0.000000e+00> : vector<128x128xf32>
    %56 = tpu.matmul %5, %55, %cst_26 {dimension_numbers = #tpu.dot_dimension_numbers<[1], [0], [0], [1], [0, 0, 1, 1], [], []>} : vector<128x64xbf16>, vector<64x128xbf16>, vector<128x128xf32> -> vector<128x128xf32>
    %57 = arith.addf %56, %11 : vector<128x128xf32>
    %58 = vector.extract_strided_slice %57 {offsets = [0, 0], sizes = [96, 128], strides = [1, 1]} : vector<128x128xf32> to vector<96x128xf32>
    %59 = arith.negf %58 : vector<96x128xf32>
    %60 = math.exp %59 : vector<96x128xf32>
    %cst_27 = arith.constant 1.000000e+00 : f32
    %61 = vector.broadcast %cst_27 : f32 to vector<96x128xf32>
    %62 = arith.addf %61, %60 : vector<96x128xf32>
    %63 = arith.divf %61, %62 : vector<96x128xf32>
    %64 = vector.extract_strided_slice %57 {offsets = [96, 0], sizes = [32, 128], strides = [1, 1]} : vector<128x128xf32> to vector<32x128xf32>
    %65 = math.tanh %64 : vector<32x128xf32>
    %66 = vector.extract_strided_slice %63 {offsets = [0, 0], sizes = [32, 128], strides = [1, 1]} : vector<96x128xf32> to vector<32x128xf32>
    %67 = vector.extract_strided_slice %63 {offsets = [32, 0], sizes = [32, 128], strides = [1, 1]} : vector<96x128xf32> to vector<32x128xf32>
    %68 = arith.mulf %67, %51#3 : vector<32x128xf32>
    %69 = arith.mulf %66, %65 : vector<32x128xf32>
    %70 = arith.addf %68, %69 : vector<32x128xf32>
    %71 = vector.broadcast %52 : i32 to vector<1x128xi32>
    %72 = arith.cmpi sgt, %2, %71 : vector<1x128xi32>
    %73 = vector.shape_cast %72 : vector<1x128xi1> to vector<1x128xi1>
    %74 = vector.broadcast %73 : vector<1x128xi1> to vector<32x128xi1>
    %75 = arith.select %74, %70, %51#3 : vector<32x128xi1>, vector<32x128xf32>
    %c0_28 = arith.constant 0 : index
    %c0_29 = arith.constant 0 : index
    %76 = vector.load %arg9[%c0_28, %c0_29] : memref<64x128xf32, #tpu.memory_space<vmem>>, vector<32x128xf32>
    tpu.vector_store %arg9[%c0_28, %c0_29], %51#1 {strides = array<i32>} : memref<64x128xf32, #tpu.memory_space<vmem>>, vector<32x128xf32>,
    %c32 = arith.constant 32 : index
    %c0_30 = arith.constant 0 : index
    %77 = vector.load %arg9[%c32, %c0_30] : memref<64x128xf32, #tpu.memory_space<vmem>>, vector<32x128xf32>
    tpu.vector_store %arg9[%c32, %c0_30], %75 {strides = array<i32>} : memref<64x128xf32, #tpu.memory_space<vmem>>, vector<32x128xf32>,
    return
  }
  func.func @transform_0(%arg0: i32, %arg1: memref<1xi32, #tpu.memory_space<smem>>) -> (i32, i32, i32) {
    %c0_i32 = arith.constant 0 : i32
    %c0_i32_0 = arith.constant 0 : i32
    %c0_i32_1 = arith.constant 0 : i32
    return %c0_i32, %c0_i32_0, %arg0 : i32, i32, i32
  }
  func.func @transform_1(%arg0: i32, %arg1: memref<1xi32, #tpu.memory_space<smem>>) -> (i32, i32) {
    %c0_i32 = arith.constant 0 : i32
    %c0_i32_0 = arith.constant 0 : i32
    return %c0_i32, %arg0 : i32, i32
  }
  func.func @transform_2(%arg0: i32, %arg1: memref<1xi32, #tpu.memory_space<smem>>) -> (i32, i32) {
    %c0_i32 = arith.constant 0 : i32
    %c0_i32_0 = arith.constant 0 : i32
    %c0_i32_1 = arith.constant 0 : i32
    return %c0_i32, %c0_i32_0 : i32, i32
  }
  func.func @transform_3(%arg0: i32, %arg1: memref<1xi32, #tpu.memory_space<smem>>) -> (i32, i32) {
    %c0_i32 = arith.constant 0 : i32
    %c0_i32_0 = arith.constant 0 : i32
    %c0_i32_1 = arith.constant 0 : i32
    return %c0_i32, %c0_i32_0 : i32, i32
  }
  func.func @transform_4(%arg0: i32, %arg1: memref<1xi32, #tpu.memory_space<smem>>) -> (i32, i32) {
    %c0_i32 = arith.constant 0 : i32
    %c0_i32_0 = arith.constant 0 : i32
    %c0_i32_1 = arith.constant 0 : i32
    return %c0_i32, %c0_i32_0 : i32, i32
  }
  func.func @transform_5(%arg0: i32, %arg1: memref<1xi32, #tpu.memory_space<smem>>) -> (i32, i32) {
    %c0_i32 = arith.constant 0 : i32
    %c0_i32_0 = arith.constant 0 : i32
    %c0_i32_1 = arith.constant 0 : i32
    return %c0_i32, %c0_i32_0 : i32, i32
  }
  func.func @transform_6(%arg0: i32, %arg1: memref<1xi32, #tpu.memory_space<smem>>) -> (i32, i32) {
    %c0_i32 = arith.constant 0 : i32
    %c0_i32_0 = arith.constant 0 : i32
    %c0_i32_1 = arith.constant 0 : i32
    return %c0_i32, %c0_i32_0 : i32, i32
  }
  func.func @transform_7(%arg0: i32, %arg1: memref<1xi32, #tpu.memory_space<smem>>) -> (i32, i32) {
    %c0_i32 = arith.constant 0 : i32
    %c0_i32_0 = arith.constant 0 : i32
    return %c0_i32, %arg0 : i32, i32
  }
}

</mosaic_0001>

<bundles_post_ra>
// kernel: text_encoder_forward.1
= control target key start
LH: loop header
LB: loop body
LE: loop exit
PB: predicated region body
PF: predicated region fallthrough
CT: control target
= control target key end

     0   :  { %v5347_v0 = vmov 0   ;;  %s5338_s5 = inlined_call_operand.vmem [shape: f32[128,1], index: 5, kind: input, shape index: {}]   ;;  %s5339_s7 = inlined_call_operand.vmem [shape: f32[128,1], index: 7, kind: input, shape index: {}]   ;;  %s5340_s0 = inlined_call_operand.<no memory space> [shape: s32[1], index: 0, kind: input, shape index: {}]   ;;  %s5341_s1 = inlined_call_operand.vmem [shape: bf16[8,32,128], index: 1, kind: input, shape index: {}]   ;;  %s5342_s8 = inlined_call_operand.vmem [shape: f32[64,128], index: 8, kind: output, shape index: {}]   ;;  %s5343_s2 = inlined_call_operand.vmem [shape: s32[1,128], index: 2, kind: input, shape index: {}]   ;;  %s5344_s3 = inlined_call_operand.vmem [shape: bf16[128,32], index: 3, kind: input, shape index: {}]   ;;  %s5345_s4 = inlined_call_operand.vmem [shape: bf16[128,32], index: 4, kind: input, shape index: {}]   ;;  %s5346_s6 = inlined_call_operand.vmem [shape: bf16[128,64], index: 6, kind: input, shape index: {}]  }
   0x1   :  { %2761 = vset.pattern.permute.xlu2 %v5347_v0  ;;  %2760 = vset.pattern.permute.xlu1 %v5347_v0  ;;  %v83_v1 = vld [vmem:[%s5338_s5 + $0x20] sm:$0xff]  ;;  %v81_v2 = vld [vmem:[%s5338_s5 + $0x10] sm:$0xff]  ;;  %v84_v4 = vld [vmem:[%s5338_s5 + $0x28] sm:$0xff]  ;;  %p2066_p0 = scmp.le.s32.totalorder %s5340_s0, 0 }
   0x2   :  { %v79_v3 = vld [vmem:[%s5338_s5] sm:$0xff]  ;;  %2759 = vset.pattern.permute.xlu0 %v5347_v0  ;;  %117 = vperm.xlu2 %2761, %v83_v1   ;;  %v82_v5 = vld [vmem:[%s5338_s5 + $0x18] sm:$0xff]  ;;  %v80_v6 = vld [vmem:[%s5338_s5 + $0x8] sm:$0xff] }
   0x3   :  { %107 = vperm.xlu1 %2760, %v81_v2   ;;  %97 = vperm.xlu0 %2759, %v79_v3   ;;  %v87_v7 = vld [vmem:[%s5338_s5 + $0x40] sm:$0xff]  ;;  %v86_v8 = vld [vmem:[%s5338_s5 + $0x38] sm:$0xff]  ;;  %v85_v9 = vld [vmem:[%s5338_s5 + $0x30] sm:$0xff] }
   0x4   :  { %v90_v10 = vld [vmem:[%s5338_s5 + $0x58] sm:$0xff]  ;;  %v89_v11 = vld [vmem:[%s5338_s5 + $0x50] sm:$0xff]  ;;  %v88_v12 = vld [vmem:[%s5338_s5 + $0x48] sm:$0xff] }
   0x5   :  { %v93_v13 = vld [vmem:[%s5338_s5 + $0x70] sm:$0xff]  ;;  %v92_v14 = vld [vmem:[%s5338_s5 + $0x68] sm:$0xff]  ;;  %v91_v15 = vld [vmem:[%s5338_s5 + $0x60] sm:$0xff] }
   0x6   :  { %v176_v16 = vld [vmem:[%s5339_s7 + $0x8] sm:$0xff]  ;;  %v175_v17 = vld [vmem:[%s5339_s7] sm:$0xff]  ;;  %v94_v18 = vld [vmem:[%s5338_s5 + $0x78] sm:$0xff] }
   0x7   :  { %v179_v19 = vld [vmem:[%s5339_s7 + $0x20] sm:$0xff]  ;;  %v178_v20 = vld [vmem:[%s5339_s7 + $0x18] sm:$0xff]  ;;  %v177_v21 = vld [vmem:[%s5339_s7 + $0x10] sm:$0xff] }
   0x8   :  { %v182_v22 = vld [vmem:[%s5339_s7 + $0x38] sm:$0xff]  ;;  %v181_v23 = vld [vmem:[%s5339_s7 + $0x30] sm:$0xff]  ;;  %v180_v24 = vld [vmem:[%s5339_s7 + $0x28] sm:$0xff] }
   0x9   :  { %v185_v25 = vld [vmem:[%s5339_s7 + $0x50] sm:$0xff]  ;;  %v184_v26 = vld [vmem:[%s5339_s7 + $0x48] sm:$0xff]  ;;  %v183_v27 = vld [vmem:[%s5339_s7 + $0x40] sm:$0xff] }
   0xa   :  { %122 = vperm.xlu2 %2761, %v84_v4   ;;  %v188_v28 = vld [vmem:[%s5339_s7 + $0x68] sm:$0xff]  ;;  %v187_v29 = vld [vmem:[%s5339_s7 + $0x60] sm:$0xff]  ;;  %v186_v30 = vld [vmem:[%s5339_s7 + $0x58] sm:$0xff] }
   0xb   :  { %112 = vperm.xlu1 %2760, %v82_v5   ;;  %102 = vperm.xlu0 %2759, %v80_v6   ;;  %v190_v31 = vld [vmem:[%s5339_s7 + $0x78] sm:$0xff]  ;;  %v189_v32 = vld [vmem:[%s5339_s7 + $0x70] sm:$0xff]  ;;  %v3463_v57 = vld [vmem:[%s5343_s2] sm:$0x1]  ;;  %s3804_s7 = smov (!%p2066_p0), 0  }
   0xc   :  { %5372 = vst [vmem:[#allocation15_spill] sm:$0xff] %v3463_v57  ;;  %v3468_v58 = vld [vmem:[%s5344_s3] sm:$0xf]  ;;  %v3473_v59 = vld [vmem:[%s5344_s3] sm:$0xf0] }
   0xd   :  { %v3478_v60 = vld [vmem:[%s5344_s3 + $0x8] sm:$0xf]  ;;  %v3483_v61 = vld [vmem:[%s5344_s3 + $0x8] sm:$0xf0]  ;;  %v3488_v62 = vld [vmem:[%s5344_s3 + $0x10] sm:$0xf] }
   0xe   :  { %v3493_v63 = vld [vmem:[%s5344_s3 + $0x10] sm:$0xf0]  ;;  %v3498_v1 = vld [vmem:[%s5344_s3 + $0x18] sm:$0xf]  ;;  %v3503_v2 = vld [vmem:[%s5344_s3 + $0x18] sm:$0xf0] }
   0xf   :  { %5373 = vst [vmem:[#allocation16_spill] sm:$0xff] %v3498_v1  ;;  %v3508_v3 = vld [vmem:[%s5344_s3 + $0x20] sm:$0xf]  ;;  %v3513_v4 = vld [vmem:[%s5344_s3 + $0x20] sm:$0xf0] }
  0x10   :  { %5374 = vst [vmem:[#allocation17_spill] sm:$0xff] %v3503_v2  ;;  %v3518_v5 = vld [vmem:[%s5344_s3 + $0x28] sm:$0xf]  ;;  %v3523_v6 = vld [vmem:[%s5344_s3 + $0x28] sm:$0xf0] }
  0x11   :  { %5375 = vst [vmem:[#allocation18_spill] sm:$0xff] %v3508_v3  ;;  %v3652_v0 = vld [vmem:[%s5346_s6 + $0x8] sm:$0xf] }
  0x12   :  { %137 = vperm.xlu2 %2761, %v87_v7   ;;  %5376 = vst [vmem:[#allocation19_spill] sm:$0xff] %v3513_v4  ;;  %v3528_v7 = vld [vmem:[%s5344_s3 + $0x30] sm:$0xf] }
  0x13   :  { %132 = vperm.xlu1 %2760, %v86_v8   ;;  %127 = vperm.xlu0 %2759, %v85_v9   ;;  %5377 = vst [vmem:[#allocation20_spill] sm:$0xff] %v3518_v5  ;;  %v3533_v8 = vld [vmem:[%s5344_s3 + $0x30] sm:$0xf0]  ;;  %v3538_v9 = vld [vmem:[%s5344_s3 + $0x38] sm:$0xf] }
  0x14   :  { %5378 = vst [vmem:[#allocation21_spill] sm:$0xff] %v3523_v6 }
  0x15   :  { %5379 = vst [vmem:[#allocation22_spill] sm:$0xff] %v3528_v7 }
  0x16   :  { %5380 = vst [vmem:[#allocation23_spill] sm:$0xff] %v3533_v8 }
  0x17   :  { %5381 = vst [vmem:[#allocation24_spill] sm:$0xff] %v3538_v9 }
  0x18   :  { %5389 = vst [vmem:[#allocation32_spill] sm:$0xff] %v3652_v0  ;;  %v3677_v0 = vld [vmem:[%s5346_s6 + $0x10] sm:$0xf] }
  0x19   :  { %5394 = vst [vmem:[#allocation37_spill] sm:$0xff] %v3677_v0 }
  0x1a   :  { %152 = vperm.xlu2 %2761, %v90_v10   ;;  %v3543_v10 = vld [vmem:[%s5344_s3 + $0x38] sm:$0xf0] }
  0x1b   :  { %147 = vperm.xlu1 %2760, %v89_v11   ;;  %142 = vperm.xlu0 %2759, %v88_v12   ;;  %5382 = vst [vmem:[#allocation25_spill] sm:$0xff] %v3543_v10  ;;  %v3548_v11 = vld [vmem:[%s5345_s4] sm:$0xf]  ;;  %v3553_v12 = vld [vmem:[%s5345_s4] sm:$0xf0] }
  0x22   :  { %167 = vperm.xlu2 %2761, %v93_v13   ;;  %v3558_v13 = vld [vmem:[%s5345_s4 + $0x8] sm:$0xf] }
  0x23   :  { %162 = vperm.xlu1 %2760, %v92_v14   ;;  %157 = vperm.xlu0 %2759, %v91_v15   ;;  %v3563_v14 = vld [vmem:[%s5345_s4 + $0x8] sm:$0xf0]  ;;  %v3568_v15 = vld [vmem:[%s5345_s4 + $0x10] sm:$0xf] }
  0x2a   :  { %198 = vperm.xlu2 %2761, %v176_v16   ;;  %v3573_v16 = vld [vmem:[%s5345_s4 + $0x10] sm:$0xf0] }
  0x2b   :  { %193 = vperm.xlu1 %2760, %v175_v17   ;;  %172 = vperm.xlu0 %2759, %v94_v18   ;;  %v3578_v17 = vld [vmem:[%s5345_s4 + $0x18] sm:$0xf] }
  0x32   :  { %213 = vperm.xlu2 %2761, %v179_v19  }
  0x33   :  { %208 = vperm.xlu1 %2760, %v178_v20   ;;  %203 = vperm.xlu0 %2759, %v177_v21   ;;  %v3587_v20 = vld [vmem:[%s5345_s4 + $0x18] sm:$0xf0]  ;;  %v3592_v21 = vld [vmem:[%s5345_s4 + $0x20] sm:$0xf] }
  0x3a   :  { %228 = vperm.xlu2 %2761, %v182_v22   ;;  %v3597_v22 = vld [vmem:[%s5345_s4 + $0x20] sm:$0xf0] }
  0x3b   :  { %223 = vperm.xlu1 %2760, %v181_v23   ;;  %218 = vperm.xlu0 %2759, %v180_v24   ;;  %v3602_v23 = vld [vmem:[%s5345_s4 + $0x28] sm:$0xf]  ;;  %v3607_v24 = vld [vmem:[%s5345_s4 + $0x28] sm:$0xf0] }
  0x42   :  { %243 = vperm.xlu2 %2761, %v185_v25   ;;  %v3612_v25 = vld [vmem:[%s5345_s4 + $0x30] sm:$0xf] }
  0x43   :  { %238 = vperm.xlu1 %2760, %v184_v26   ;;  %233 = vperm.xlu0 %2759, %v183_v27   ;;  %v3617_v26 = vld [vmem:[%s5345_s4 + $0x30] sm:$0xf0]  ;;  %v3622_v27 = vld [vmem:[%s5345_s4 + $0x38] sm:$0xf] }
  0x4a   :  { %258 = vperm.xlu2 %2761, %v188_v28   ;;  %v3627_v28 = vld [vmem:[%s5345_s4 + $0x38] sm:$0xf0] }
  0x4b   :  { %253 = vperm.xlu1 %2760, %v187_v29   ;;  %248 = vperm.xlu0 %2759, %v186_v30   ;;  %v3632_v29 = vld [vmem:[%s5346_s6] sm:$0xf] }
  0x4c   :  { %5385 = vst [vmem:[#allocation28_spill] sm:$0xff] %v3632_v29  ;;  %v3637_v30 = vld [vmem:[%s5346_s6] sm:$0xf]  ;;  %v3657_v29 = vld [vmem:[%s5346_s6 + $0x8] sm:$0xf] }
  0x4d   :  { %5386 = vst [vmem:[#allocation29_spill] sm:$0xff] %v3637_v30 }
  0x4e   :  { %5390 = vst [vmem:[#allocation33_spill] sm:$0xff] %v3657_v29 }
  0x53   :  { %268 = vperm.xlu1 %2760, %v190_v31   ;;  %263 = vperm.xlu0 %2759, %v189_v32   ;;  %v3642_v31 = vld [vmem:[%s5346_s6] sm:$0xf0] }
  0x54   :  { %5387 = vst [vmem:[#allocation30_spill] sm:$0xff] %v3642_v31  ;;  %v3647_v32 = vld [vmem:[%s5346_s6] sm:$0xf0]  ;;  %v3667_v31 = vld [vmem:[%s5346_s6 + $0x8] sm:$0xf0] }
  0x55   :  { %5388 = vst [vmem:[#allocation31_spill] sm:$0xff] %v3647_v32 }
  0x56   :  { %5392 = vst [vmem:[#allocation35_spill] sm:$0xff] %v3667_v31 }
  0x5c   :  { %v3412_v33 = vpop.permute.xlu2 %117 }
  0x5d   :  { %5362 = vst [vmem:[#allocation5_spill] sm:$0xff] %v3412_v33 }
  0x64   :  { %v3414_v34 = vpop.permute.xlu2 %122 }
  0x65   :  { %5363 = vst [vmem:[#allocation6_spill] sm:$0xff] %v3414_v34 }
  0x6c   :  { %v3416_v35 = vpop.permute.xlu2 %137 }
  0x74   :  { %v3418_v36 = vpop.permute.xlu2 %152 }
  0x75   :  { %v3420_v37 = vpop.permute.xlu1 %107  ;;  %v3422_v38 = vpop.permute.xlu0 %97 }
  0x7c   :  { %v3424_v39 = vpop.permute.xlu2 %167 }
  0x7d   :  { %v3426_v40 = vpop.permute.xlu1 %112  ;;  %v3428_v41 = vpop.permute.xlu0 %102 }
  0x84   :  { %v3430_v42 = vpop.permute.xlu2 %198 }
  0x85   :  { %5364 = vst [vmem:[#allocation7_spill] sm:$0xff] %v3430_v42  ;;  %v3432_v43 = vpop.permute.xlu1 %132  ;;  %v3434_v44 = vpop.permute.xlu0 %127  ;;  %v3736_v42 = vld [vmem:[%s5346_s6 + $0x28] sm:$0xf] }
  0x86   :  { %5407 = vst [vmem:[#allocation50_spill] sm:$0xff] %v3736_v42  ;;  %v3761_v42 = vld [vmem:[%s5346_s6 + $0x30] sm:$0xf] }
  0x87   :  { %5412 = vst [vmem:[#allocation55_spill] sm:$0xff] %v3761_v42  ;;  %v3786_v42 = vld [vmem:[%s5346_s6 + $0x38] sm:$0xf0] }
  0x88   :  { %5417 = vst [vmem:[#allocation60_spill] sm:$0xff] %v3786_v42 }
  0x8c   :  { %v3436_v45 = vpop.permute.xlu2 %213 }
  0x8d   :  { %5365 = vst [vmem:[#allocation8_spill] sm:$0xff] %v3436_v45  ;;  %v3438_v46 = vpop.permute.xlu1 %147  ;;  %v3440_v47 = vpop.permute.xlu0 %142  ;;  %v3702_v45 = vld [vmem:[%s5346_s6 + $0x18] sm:$0xf0] }
  0x8e   :  { %5399 = vst [vmem:[#allocation42_spill] sm:$0xff] %v3702_v45  ;;  %v3726_v45 = vld [vmem:[%s5346_s6 + $0x20] sm:$0xf0] }
  0x8f   :  { %5405 = vst [vmem:[#allocation48_spill] sm:$0xff] %v3726_v45  ;;  %v3751_v45 = vld [vmem:[%s5346_s6 + $0x28] sm:$0xf0] }
  0x90   :  { %5410 = vst [vmem:[#allocation53_spill] sm:$0xff] %v3751_v45 }
  0x94   :  { %v3442_v48 = vpop.permute.xlu2 %228 }
  0x95   :  { %5366 = vst [vmem:[#allocation9_spill] sm:$0xff] %v3442_v48  ;;  %v3444_v49 = vpop.permute.xlu1 %162  ;;  %v3446_v50 = vpop.permute.xlu0 %157  ;;  %v3662_v48 = vld [vmem:[%s5346_s6 + $0x8] sm:$0xf0] }
  0x96   :  { %5391 = vst [vmem:[#allocation34_spill] sm:$0xff] %v3662_v48  ;;  %v3687_v48 = vld [vmem:[%s5346_s6 + $0x10] sm:$0xf0] }
  0x97   :  { %5396 = vst [vmem:[#allocation39_spill] sm:$0xff] %v3687_v48 }
  0x9c   :  { %v3448_v51 = vpop.permute.xlu2 %243 }
  0x9d   :  { %5367 = vst [vmem:[#allocation10_spill] sm:$0xff] %v3448_v51  ;;  %v3450_v52 = vpop.permute.xlu1 %193  ;;  %v3452_v53 = vpop.permute.xlu0 %172  ;;  %v3711_v51 = vld [vmem:[%s5346_s6 + $0x18] sm:$0xf0] }
  0x9e   :  { %5368 = vst [vmem:[#allocation11_spill] sm:$0xff] %v3450_v52  ;;  %v3756_v52 = vld [vmem:[%s5346_s6 + $0x30] sm:$0xf] }
  0x9f   :  { %5402 = vst [vmem:[#allocation45_spill] sm:$0xff] %v3711_v51  ;;  %v3766_v51 = vld [vmem:[%s5346_s6 + $0x30] sm:$0xf0] }
  0xa0   :  { %5411 = vst [vmem:[#allocation54_spill] sm:$0xff] %v3756_v52  ;;  %v3781_v52 = vld [vmem:[%s5346_s6 + $0x38] sm:$0xf] }
  0xa1   :  { %5413 = vst [vmem:[#allocation56_spill] sm:$0xff] %v3766_v51  ;;  %v3791_v51 = vld [vmem:[%s5346_s6 + $0x38] sm:$0xf0] }
  0xa2   :  { %5416 = vst [vmem:[#allocation59_spill] sm:$0xff] %v3781_v52 }
  0xa3   :  { %5418 = vst [vmem:[#allocation61_spill] sm:$0xff] %v3791_v51 }
  0xa4   :  { %v3454_v54 = vpop.permute.xlu2 %258 }
  0xa5   :  { %5369 = vst [vmem:[#allocation12_spill] sm:$0xff] %v3454_v54  ;;  %v3456_v55 = vpop.permute.xlu1 %208  ;;  %v3458_v56 = vpop.permute.xlu0 %203  ;;  %v3682_v54 = vld [vmem:[%s5346_s6 + $0x10] sm:$0xf0] }
  0xa6   :  { %5370 = vst [vmem:[#allocation13_spill] sm:$0xff] %v3456_v55 }
  0xa7   :  { %5371 = vst [vmem:[#allocation14_spill] sm:$0xff] %v3458_v56  ;;  %v3721_v56 = vld [vmem:[%s5346_s6 + $0x20] sm:$0xf] }
  0xa8   :  { %5395 = vst [vmem:[#allocation38_spill] sm:$0xff] %v3682_v54 }
  0xa9   :  { %5404 = vst [vmem:[#allocation47_spill] sm:$0xff] %v3721_v56 }
  0xad   :  { %v3580_v18 = vpop.permute.xlu1 %223  ;;  %v3582_v19 = vpop.permute.xlu0 %218 }
  0xae   :  { %5383 = vst [vmem:[#allocation26_spill] sm:$0xff] %v3580_v18  ;;  %v3672_v18 = vld [vmem:[%s5346_s6 + $0x10] sm:$0xf] }
  0xaf   :  { %5384 = vst [vmem:[#allocation27_spill] sm:$0xff] %v3582_v19  ;;  %v3692_v19 = vld [vmem:[%s5346_s6 + $0x18] sm:$0xf] }
  0xb0   :  { %5393 = vst [vmem:[#allocation36_spill] sm:$0xff] %v3672_v18  ;;  %v3697_v18 = vld [vmem:[%s5346_s6 + $0x18] sm:$0xf] }
  0xb1   :  { %5397 = vst [vmem:[#allocation40_spill] sm:$0xff] %v3692_v19  ;;  %v3716_v19 = vld [vmem:[%s5346_s6 + $0x20] sm:$0xf] }
  0xb2   :  { %5398 = vst [vmem:[#allocation41_spill] sm:$0xff] %v3697_v18  ;;  %v3776_v18 = vld [vmem:[%s5346_s6 + $0x38] sm:$0xf] }
  0xb3   :  { %5403 = vst [vmem:[#allocation46_spill] sm:$0xff] %v3716_v19  ;;  %v3741_v19 = vld [vmem:[%s5346_s6 + $0x28] sm:$0xf] }
  0xb4   :  { %5408 = vst [vmem:[#allocation51_spill] sm:$0xff] %v3741_v19 }
  0xb5   :  { %v3704_v54 = vpop.permute.xlu1 %238  ;;  %v3706_v55 = vpop.permute.xlu0 %233  ;;  %5415 = vst [vmem:[#allocation58_spill] sm:$0xff] %v3776_v18 }
  0xb6   :  { %5400 = vst [vmem:[#allocation43_spill] sm:$0xff] %v3704_v54  ;;  %v3731_v54 = vld [vmem:[%s5346_s6 + $0x20] sm:$0xf0] }
  0xb7   :  { %5401 = vst [vmem:[#allocation44_spill] sm:$0xff] %v3706_v55  ;;  %v3746_v55 = vld [vmem:[%s5346_s6 + $0x28] sm:$0xf0] }
  0xb8   :  { %5406 = vst [vmem:[#allocation49_spill] sm:$0xff] %v3731_v54 }
  0xb9   :  { %5409 = vst [vmem:[#allocation52_spill] sm:$0xff] %v3746_v55  ;;  %v3771_v55 = vld [vmem:[%s5346_s6 + $0x30] sm:$0xf0] }
  0xba   :  { %5414 = vst [vmem:[#allocation57_spill] sm:$0xff] %v3771_v55 }
  0xbd   :  { %v3793_v55 = vpop.permute.xlu1 %253  ;;  %v3795_v48 = vpop.permute.xlu0 %248 }
  0xbe   :  { %5419 = vst [vmem:[#allocation62_spill] sm:$0xff] %v3793_v55 }
  0xbf   :  { %5420 = vst [vmem:[#allocation63_spill] sm:$0xff] %v3795_v48 }
  0xc3   :  { %2010 = sbr.rel (%p2066_p0) target bundleno = 373 (0x175), region = 59 }
  0xc5   :  { %v3797_v18 = vpop.permute.xlu1 %268  ;;  %v3799_v0 = vpop.permute.xlu0 %263 }
  0xc6   :  { %5421 = vst [vmem:[#allocation64_spill] sm:$0xff] %v3797_v18 }
  0xc7   :  { %5422 = vst [vmem:[#allocation65_spill] sm:$0xff] %v3799_v0 }
  0xc8 LB: > { %s2328_s6 = sshll.u32 %s3132_s7, 4  ;;  %v2072_v0 = vor.u32 %v3473_v59, %v3468_v58  ;;  %v2080_v55 = vor.u32 %v3493_v63, %v3488_v62  ;;  %vm336_vm0 = vcmask 261120   ;;  %v5423_v3 = vld [vmem:[#allocation18_spill] sm:$0xff]  ;;  %v5424_v4 = vld [vmem:[#allocation19_spill] sm:$0xff]  ;;  %v5427_v1 = vld [vmem:[#allocation16_spill] sm:$0xff]  ;;  %s2331_s26 = sshll.u32 %s3132_s7, 6  ;;  %s3132_s7 = sphi %s3804_s7, %s274_s7  }
  0xc9   : > { %s279_s5 = scalar_lea.vmem %s5341_s1, %s2328_s6  ;;  %v2088_v48 = vor.u32 %v5424_v4, %v5423_v3  ;;  %v5425_v7 = vld [vmem:[#allocation22_spill] sm:$0xff]  ;;  %v5426_v8 = vld [vmem:[#allocation23_spill] sm:$0xff]  ;;  %v5428_v2 = vld [vmem:[#allocation17_spill] sm:$0xff]  ;;  %s3842_s27 = scalar_lea.vmem [#allocation2], %s2331_s26 }
  0xca   : > { %v2330_v42 = vld [vmem:[%s279_s5 + $0x8] sm:$0xff]  ;;  %v2329_v18 = vld [vmem:[%s279_s5] sm:$0xff]  ;;  %v2096_v51 = vor.u32 %v5426_v8, %v5425_v7  ;;  %v2084_v3 = vor.u32 %v5428_v2, %v5427_v1  ;;  %v5429_v5 = vld [vmem:[#allocation20_spill] sm:$0xff]  ;;  %s274_s7 = sadd.s32 1, %s3132_s7  }
  0xcb   : > { %367 = vmatpush.bf16.msra.mxu0 %v2330_v42  ;;  %2458 = vmatpush.bf16.msra.mxu1 %v2330_v42  ;;  %v5430_v6 = vld [vmem:[#allocation21_spill] sm:$0xff]  ;;  %v5431_v9 = vld [vmem:[#allocation24_spill] sm:$0xff]  ;;  %v5434_v34 = vld [vmem:[#allocation6_spill] sm:$0xff]  ;;  %p273_p1 = scmp.ge.s32.totalorder %s274_s7, %s5340_s0 }
  0xcc   : > { %2459 = vmatpush.bf16.msra.mxu2 %v2330_v42  ;;  %2460 = vmatpush.bf16.msra.mxu3 %v2330_v42  ;;  %v2076_v42 = vor.u32 %v3483_v61, %v3478_v60  ;;  %v2092_v4 = vor.u32 %v5430_v6, %v5429_v5  ;;  %v5432_v10 = vld [vmem:[#allocation25_spill] sm:$0xff] }
  0xcd   : > { %v5433_v33 = vld [vmem:[#allocation5_spill] sm:$0xff] }
  0xcf   : > { %368 = vmatpush.bf16.msra.mxu0 %v2329_v18  ;;  %2461 = vmatpush.bf16.msra.mxu1 %v2329_v18 }
  0xd0   : > { %2462 = vmatpush.bf16.msra.mxu2 %v2329_v18  ;;  %2463 = vmatpush.bf16.msra.mxu3 %v2329_v18  ;;  %v2100_v18 = vor.u32 %v5432_v10, %v5431_v9 }
  0xd2   : > { %2109 = vmatmul.msk.bf16.vlgmr.msra.gmra.mxu0 %vm336_vm0, %v2072_v0  ;;  %2111 = vmatmul.msk.bf16.vlgmr.msra.gmra.mxu1 %vm336_vm0, %v2080_v55 }
  0xd3   : > { %2113 = vmatmul.msk.bf16.vlgmr.msra.gmra.mxu2 %vm336_vm0, %v2088_v48  ;;  %2115 = vmatmul.msk.bf16.vlgmr.msra.gmra.mxu3 %vm336_vm0, %v2096_v51 }
  0xe2   : > { %2110 = vmatmul.msk.bf16.gmra.mxu0 %vm336_vm0, %v2076_v42  ;;  %2112 = vmatmul.msk.bf16.gmra.mxu1 %vm336_vm0, %v2084_v3 }
  0xe3   : > { %2114 = vmatmul.msk.bf16.gmra.mxu2 %vm336_vm0, %v2092_v4  ;;  %2116 = vmatmul.msk.bf16.gmra.mxu3 %vm336_vm0, %v2100_v18 }
 0x14f   : > { %v370_v0 = vpop.f32.mrf.mxu0  ;;  %v380_v48 = vpop.f32.mrf.mxu1 }
 0x150   : > { %v371_v5 = vadd.f32 %v370_v0, %v3422_v38  ;;  %v381_v6 = vadd.f32 %v380_v48, %v5433_v33 }
 0x156   : > { %v390_v51 = vpop.f32.mrf.mxu2  ;;  %v400_v55 = vpop.f32.mrf.mxu3 }
 0x157   : > { %v372_v1 = vpop.f32.mrf.mxu0  ;;  %v382_v2 = vpop.f32.mrf.mxu1  ;;  %v391_v0 = vadd.f32 %v390_v51, %v3416_v35  ;;  %v401_v48 = vadd.f32 %v400_v55, %v3446_v50 }
 0x158   : > { %v373_v7 = vadd.f32 %v372_v1, %v3428_v41  ;;  %v383_v42 = vadd.f32 %v382_v2, %v5434_v34 }
 0x15a   : > { %v2336_v3 = vpack.c.bf16 %v373_v7, %v371_v5  ;;  %v2346_v8 = vpack.c.bf16 %v383_v42, %v381_v6 }
 0x15c   : > { %2337 = vst [vmem:[%s3842_s27] sm:$0xff] %v2336_v3  }
 0x15d   : > { %2438 = vst [vmem:[%s3842_s27 + $0x10] sm:$0xff] %v2346_v8  }
 0x15e   : > { %v392_v4 = vpop.f32.mrf.mxu2  ;;  %v402_v18 = vpop.f32.mrf.mxu3 }
 0x15f   : > { %v393_v1 = vadd.f32 %v392_v4, %v3440_v47  ;;  %v403_v2 = vadd.f32 %v402_v18, %v3444_v49  ;;  %v375_v5 = vpop.f32.mrf.mxu0  ;;  %v385_v6 = vpop.f32.mrf.mxu1 }
 0x160   : > { %v376_v51 = vadd.f32 %v375_v5, %v3420_v37  ;;  %v386_v55 = vadd.f32 %v385_v6, %v3434_v44 }
 0x161   : > { %v2356_v7 = vpack.c.bf16 %v393_v1, %v391_v0  ;;  %v2366_v42 = vpack.c.bf16 %v403_v2, %v401_v48 }
 0x163   : > { %2440 = vst [vmem:[%s3842_s27 + $0x20] sm:$0xff] %v2356_v7  }
 0x164   : > { %2442 = vst [vmem:[%s3842_s27 + $0x30] sm:$0xff] %v2366_v42  }
 0x166   : > { %v395_v3 = vpop.f32.mrf.mxu2  ;;  %v405_v8 = vpop.f32.mrf.mxu3 }
 0x167   : > { %v377_v9 = vpop.f32.mrf.mxu0  ;;  %v387_v10 = vpop.f32.mrf.mxu1  ;;  %v396_v1 = vadd.f32 %v395_v3, %v3438_v46  ;;  %v406_v2 = vadd.f32 %v405_v8, %v3424_v39 }
 0x168   : > { %v378_v4 = vadd.f32 %v377_v9, %v3426_v40  ;;  %v388_v18 = vadd.f32 %v387_v10, %v3432_v43 }
 0x16a   : > { %v2341_v33 = vpack.c.bf16 %v378_v4, %v376_v51  ;;  %v2351_v34 = vpack.c.bf16 %v388_v18, %v386_v55 }
 0x16c   : > { %2437 = vst [vmem:[%s3842_s27 + $0x8] sm:$0xff] %v2341_v33  }
 0x16d   : > { %2439 = vst [vmem:[%s3842_s27 + $0x18] sm:$0xff] %v2351_v34  }
 0x16e   : > { %v397_v0 = vpop.f32.mrf.mxu2  ;;  %v407_v48 = vpop.f32.mrf.mxu3 }
 0x16f   : > { %v398_v5 = vadd.f32 %v397_v0, %v3418_v36  ;;  %v408_v7 = vadd.f32 %v407_v48, %v3452_v53 }
 0x170   :  { %276 = sbr.rel (!%p273_p1) target bundleno = 200 (0xc8), region = 65 }
 0x171   : > { %v2361_v6 = vpack.c.bf16 %v398_v5, %v396_v1  ;;  %v2371_v42 = vpack.c.bf16 %v408_v7, %v406_v2 }
 0x173   : > { %2441 = vst [vmem:[%s3842_s27 + $0x28] sm:$0xff] %v2361_v6  }
 0x174   : > { %2443 = vst [vmem:[%s3842_s27 + $0x38] sm:$0xff] %v2371_v42  }
 0x175 PF:  { %v5435_v33 = vmov 0   ;;  %v3874_v34 = vor.u32 %v3553_v12, %v3548_v11  ;;  %vm517_vm1 = vcmask 261120   ;;  %v3878_v9 = vor.u32 %v3573_v16, %v3568_v15  ;;  %p2171_p2 = scmp.le.s32.totalorder %s5340_s0, 1 }
 0x176   :  { %549 = vmatpush.bf16.msra.mxu0 %v5435_v33  ;;  %2464 = vmatpush.bf16.msra.mxu1 %v5435_v33  ;;  %v3882_v10 = vor.u32 %v3597_v22, %v3592_v21  ;;  %v3888_v35 = vor.u32 %v3617_v26, %v3612_v25  ;;  %v3900_v36 = vor.u32 %v3563_v14, %v3558_v13  ;;  %vm859_vm2 = vcmp.gt.s32.totalorder %v3463_v57, 0  ;;  %s4240_s10 = smov (!%p2171_p2), 1  }
 0x177   :  { %5436 = vst [vmem:[#allocation5_spill] sm:$0xff] %v3874_v34  ;;  %2465 = vmatpush.bf16.msra.mxu2 %v5435_v33  ;;  %2466 = vmatpush.bf16.msra.mxu3 %v5435_v33  ;;  %v3904_v37 = vor.u32 %v3587_v20, %v3578_v17  ;;  %v3908_v38 = vor.u32 %v3607_v24, %v3602_v23  ;;  %v860_v55 = vsel %vm859_vm2, 1, %v5435_v33 }
 0x178   :  { %5437 = vst [vmem:[#allocation6_spill] sm:$0xff] %v3878_v9  ;;  %v3912_v39 = vor.u32 %v3627_v28, %v3622_v27  ;;  %v861_v7 = vperm.slane %v860_v55, 0 }
 0x179   :  { %5438 = vst [vmem:[#allocation16_spill] sm:$0xff] %v3882_v10  ;;  %2151 = vmatmul.msk.bf16.vlgmr.msra.gmra.mxu0 %vm517_vm1, %v3874_v34  ;;  %2153 = vmatmul.msk.bf16.vlgmr.msra.gmra.mxu1 %vm517_vm1, %v3878_v9 }
 0x17a   :  { %5439 = vst [vmem:[#allocation17_spill] sm:$0xff] %v3888_v35  ;;  %2155 = vmatmul.msk.bf16.vlgmr.msra.gmra.mxu2 %vm517_vm1, %v3882_v10  ;;  %2157 = vmatmul.msk.bf16.vlgmr.msra.gmra.mxu3 %vm517_vm1, %v3888_v35  ;;  %vm3967_vm7 = vcmp.eq.s32.totalorder %v861_v7, 1 }
 0x17b   :  { %5440 = vst [vmem:[#allocation18_spill] sm:$0xff] %v3900_v36  ;;  %v2374_v40 = vld [vmem:[#allocation2] sm:$0xff]   ;;  %v2445_v41 = vld [vmem:[#allocation2 + $0x10] sm:$0xff]   ;;  %v3924_v20 = vld [vmem:[#allocation2 + $0x8] sm:$0xff]  }
 0x17c   :  { %5441 = vst [vmem:[#allocation19_spill] sm:$0xff] %v3904_v37  ;;  %v2375_v43 = vunpack.c.l.bf16 %v2374_v40  ;;  %v2383_v44 = vunpack.c.l.bf16 %v2445_v41  ;;  %v2447_v53 = vld [vmem:[#allocation2 + $0x20] sm:$0xff]   ;;  %v2376_v61 = vunpack.c.h.bf16 %v2374_v40  ;;  %v2384_v62 = vunpack.c.h.bf16 %v2445_v41  ;;  %v3922_v14 = vld [vmem:[#allocation2 + $0x30] sm:$0xff]   ;;  %v3928_v24 = vld [vmem:[#allocation2 + $0x18] sm:$0xff]  }
 0x17d   :  { %5442 = vst [vmem:[#allocation20_spill] sm:$0xff] %v3908_v38  ;;  %v2391_v60 = vunpack.c.l.bf16 %v2447_v53  ;;  %v2399_v23 = vunpack.c.l.bf16 %v3922_v14  ;;  %v2392_v28 = vunpack.c.h.bf16 %v2447_v53  ;;  %v2379_v8 = vunpack.c.l.bf16 %v3924_v20  ;;  %v3939_v48 = vld [vmem:[#allocation2 + $0x28] sm:$0xff]  }
 0x17e   :  { %5443 = vst [vmem:[#allocation21_spill] sm:$0xff] %v3912_v39  ;;  %v2387_v4 = vunpack.c.l.bf16 %v3928_v24  ;;  %v2400_v42 = vunpack.c.h.bf16 %v3922_v14  ;;  %v2395_v33 = vunpack.c.l.bf16 %v3939_v48 }
 0x189   :  { %2152 = vmatmul.msk.bf16.gmra.mxu0 %vm517_vm1, %v3900_v36  ;;  %2154 = vmatmul.msk.bf16.gmra.mxu1 %vm517_vm1, %v3904_v37 }
 0x18a   :  { %2156 = vmatmul.msk.bf16.gmra.mxu2 %vm517_vm1, %v3908_v38  ;;  %2158 = vmatmul.msk.bf16.gmra.mxu3 %vm517_vm1, %v3912_v39 }
 0x1f6   :  { %v551_v46 = vpop.f32.mrf.mxu0  ;;  %v561_v47 = vpop.f32.mrf.mxu1 }
 0x1f7   :  { %v591_v49 = vadd.f32 %v2375_v43, %v551_v46  ;;  %v595_v50 = vadd.f32 %v2383_v44, %v561_v47  ;;  %v2380_v44 = vunpack.c.h.bf16 %v3924_v20 }
 0x1f9   :  { %v2159_v58 = vmul.f32 -1.442695, %v591_v49  ;;  %v2163_v59 = vmul.f32 -1.442695, %v595_v50 }
 0x1fb   :  { %2762 = vpow2.f32 %v2159_v58 }
 0x1fc   :  { %2764 = vpow2.f32 %v2163_v59 }
 0x1fd   :  { %v571_v63 = vpop.f32.mrf.mxu2  ;;  %v581_v51 = vpop.f32.mrf.mxu3 }
 0x1fe   :  { %v599_v11 = vadd.f32 %v2391_v60, %v571_v63  ;;  %v553_v12 = vpop.f32.mrf.mxu0  ;;  %v563_v13 = vpop.f32.mrf.mxu1  ;;  %v603_v18 = vadd.f32 %v2399_v23, %v581_v51  ;;  %v2388_v63 = vunpack.c.h.bf16 %v3928_v24  ;;  %v4176_v51 = vmov 0.0  }
 0x1ff   :  { %v592_v15 = vadd.f32 %v2376_v61, %v553_v12  ;;  %v596_v16 = vadd.f32 %v2384_v62, %v563_v13 }
 0x200   :  { %v2167_v17 = vmul.f32 -1.442695, %v599_v11 }
 0x201   :  { %v2763_v21 = vpop.eup %2762  ;;  %v2160_v22 = vmul.f32 -1.442695, %v592_v15  ;;  %v2164_v27 = vmul.f32 -1.442695, %v596_v16 }
 0x202   :  { %v2765_v25 = vpop.eup %2764  ;;  %v3930_v26 = vadd.f32 1.0, %v2763_v21  ;;  %2766 = vpow2.f32 %v2167_v17 }
 0x203   :  { %v3932_v3 = vadd.f32 1.0, %v2765_v25  ;;  %2768 = vpow2.f32 %v2160_v22 }
 0x204   :  { %2770 = vrcp.f32 %v3930_v26  ;;  %v664_v49 = vand.u32 2147483647, %v3930_v26  ;;  %v666_v50 = vand.u32 2147483648, %v3930_v26  ;;  %vm660_vm3 = vweird.f32 %v3930_v26 }
 0x205   :  { %2772 = vrcp.f32 %v3932_v3  ;;  %v573_v0 = vpop.f32.mrf.mxu2  ;;  %v726_v58 = vand.u32 2147483648, %v3932_v3  ;;  %vm720_vm4 = vweird.f32 %v3932_v3  ;;  %v724_v17 = vand.u32 2147483647, %v3932_v3  ;;  %v583_v25 = vpop.f32.mrf.mxu3 }
 0x206   :  { %2774 = vpow2.f32 %v2164_v27  ;;  %v600_v1 = vadd.f32 %v2392_v28, %v573_v0  ;;  %v556_v2 = vpop.f32.mrf.mxu0  ;;  %v566_v5 = vpop.f32.mrf.mxu1  ;;  %vm3960_vm5 = vcmp.eq.f32.partialorder %v664_v49, 8.507059e+37  ;;  %v667_v23 = vor.u32 1.1754944e-38, %v666_v50 }
 0x207   :  { %v593_v6 = vadd.f32 %v2379_v8, %v556_v2  ;;  %v597_v43 = vadd.f32 %v2387_v4, %v566_v5  ;;  %2776 = vtanh.f32 %v603_v18  ;;  %v727_v22 = vor.u32 1.1754944e-38, %v726_v58 }
 0x208   :  { %v2767_v40 = vpop.eup %2766  ;;  %v2168_v41 = vmul.f32 -1.442695, %v600_v1  ;;  %vm3974_vm9 = vcmp.eq.f32.partialorder %v724_v17, 8.507059e+37 }
 0x209   :  { %v2769_v46 = vpop.eup %2768  ;;  %v3944_v47 = vadd.f32 1.0, %v2767_v40  ;;  %v2161_v60 = vmul.f32 -1.442695, %v593_v6  ;;  %v2165_v13 = vmul.f32 -1.442695, %v597_v43  ;;  %v604_v6 = vadd.f32 %v2400_v42, %v583_v25 }
 0x20a   :  { %v2771_v53 = vpop.eup %2770  ;;  %v3949_v59 = vadd.f32 1.0, %v2769_v46  ;;  %2778 = vpow2.f32 %v2168_v41  ;;  %v2396_v43 = vunpack.c.h.bf16 %v3939_v48 }
 0x20b   :  { %v2773_v61 = vpop.eup %2772  ;;  %v656_v62 = vmul.f32 %v2771_v53, %v3930_v26  ;;  %2780 = vrcp.f32 %v3944_v47  ;;  %v786_v28 = vand.u32 2147483648, %v3944_v47  ;;  %vm661_vm6 = vweird.f32 %v2771_v53 }
 0x20c   :  { %v2775_v11 = vpop.eup %2774  ;;  %v716_v12 = vmul.f32 %v2773_v61, %v3932_v3  ;;  %2782 = vrcp.f32 %v3949_v59  ;;  %v784_v18 = vand.u32 2147483647, %v3944_v47  ;;  %vm721_vm8 = vweird.f32 %v2773_v61  ;;  %vm662_vm11 = vmor %vm660_vm3, %vm661_vm6 }
 0x20d   :  { %v657_v14 = vsub.f32 1.0, %v656_v62  ;;  %v3958_v15 = vadd.f32 1.0, %v2775_v11  ;;  %2784 = vpow2.f32 %v2161_v60  ;;  %v2777_v27 = vpop.eup %2776  ;;  %vm780_vm10 = vweird.f32 %v3944_v47  ;;  %vm722_vm12 = vmor %vm720_vm4, %vm721_vm8 }
 0x20e   :  { %v717_v21 = vsub.f32 1.0, %v716_v12  ;;  %v787_v46 = vor.u32 1.1754944e-38, %v786_v28  ;;  %vm3995_vm13 = vcmp.eq.f32.partialorder %v784_v18, 8.507059e+37  ;;  %vm675_vm14 = vweird.f32 %v3949_v59 }
 0x20f   :  { %2786 = vrcp.f32 %v3958_v15  ;;  %v658_v8 = vmul.f32 %v2771_v53, %v657_v14  ;;  %vm735_vm15 = vweird.f32 %v3958_v15 }
 0x210   :  { %v2779_v55 = vpop.eup %2778  ;;  %v718_v4 = vmul.f32 %v2773_v61, %v717_v21  ;;  %2788 = vpow2.f32 %v2165_v13 }
 0x211   :  { %v3972_v0 = vpop.eup %2780  ;;  %v659_v1 = vadd.f32 %v2771_v53, %v658_v8  ;;  %v3978_v5 = vadd.f32 1.0, %v2779_v55  ;;  %v679_v8 = vand.u32 2147483647, %v3949_v59 }
 0x212   :  { %v3980_v7 = vpop.eup %2782  ;;  %v776_v40 = vmul.f32 %v3972_v0, %v3944_v47  ;;  %v719_v41 = vadd.f32 %v2773_v61, %v718_v4  ;;  %vm781_vm0 = vweird.f32 %v3972_v0 }
 0x213   :  { %v671_v49 = vmul.f32 %v3980_v7, %v3949_v59  ;;  %v663_v50 = vsel %vm662_vm11, %v2771_v53, %v659_v1  ;;  %2790 = vrcp.f32 %v3978_v5  ;;  %v2785_v42 = vpop.eup %2784  ;;  %vm4020_vm2 = vmor %vm780_vm10, %vm781_vm0  ;;  %vm676_vm3 = vweird.f32 %v3980_v7 }
 0x214   :  { %v777_v58 = vsub.f32 1.0, %v776_v40  ;;  %v668_v26 = vsel %vm3960_vm5, %v667_v23, %v663_v50  ;;  %v723_v62 = vsel %vm722_vm12, %v2773_v61, %v719_v41  ;;  %v741_v61 = vand.u32 2147483648, %v3958_v15  ;;  %v576_v41 = vpop.f32.mrf.mxu2  ;;  %vm4045_vm4 = vmor %vm675_vm14, %vm676_vm3 }
 0x215   :  { %v2787_v11 = vpop.eup %2786  ;;  %v672_v53 = vsub.f32 1.0, %v671_v49  ;;  %v728_v3 = vsel %vm3974_vm9, %v727_v22, %v723_v62  ;;  %v843_v12 = vmul.f32 %v2777_v27, %v668_v26  ;;  %v4009_v21 = vadd.f32 1.0, %v2785_v42  ;;  %v568_v26 = vpop.f32.mrf.mxu1 }
 0x216   :  { %v2789_v13 = vpop.eup %2788  ;;  %v778_v14 = vmul.f32 %v3972_v0, %v777_v58  ;;  %v731_v17 = vmul.f32 %v2787_v11, %v3958_v15  ;;  %v839_v16 = vmul.f32 0.0, %v728_v3  ;;  %v681_v1 = vand.u32 2147483648, %v3949_v59  ;;  %v558_v58 = vpop.f32.mrf.mxu0 }
 0x217   :  { %v4011_v23 = vadd.f32 1.0, %v2789_v13  ;;  %v673_v25 = vmul.f32 %v3980_v7, %v672_v53  ;;  %2792 = vrcp.f32 %v4009_v21  ;;  %v742_v49 = vor.u32 1.1754944e-38, %v741_v61  ;;  %v4053_v13 = vld [vmem:[#allocation2 + $0x38] sm:$0xff]  }
 0x218   :  { %v779_v28 = vadd.f32 %v3972_v0, %v778_v14  ;;  %v732_v22 = vsub.f32 1.0, %v731_v17  ;;  %v847_v27 = vadd.f32 %v843_v12, %v839_v16  ;;  %v739_v42 = vand.u32 2147483647, %v3958_v15 }
 0x219   :  { %v4016_v55 = vpop.eup %2790  ;;  %v674_v18 = vadd.f32 %v3980_v7, %v673_v25  ;;  %v801_v62 = vand.u32 2147483648, %v3978_v5  ;;  %vm4049_vm5 = vcmp.eq.f32.partialorder %v679_v8, 8.507059e+37  ;;  %vm736_vm6 = vweird.f32 %v2787_v11 }
 0x21a   :  { %v783_v2 = vsel %vm4020_vm2, %v3972_v0, %v779_v28  ;;  %v733_v40 = vmul.f32 %v2787_v11, %v732_v22  ;;  %2794 = vtanh.f32 %v847_v27  ;;  %v4033_v47 = vsel %vm3967_vm7, %v847_v27, 0.0   ;;  %vm737_vm8 = vmor %vm735_vm15, %vm736_vm6 }
 0x21b   :  { %v791_v50 = vmul.f32 %v4016_v55, %v3978_v5  ;;  %2796 = vrcp.f32 %v4011_v23  ;;  %v756_v0 = vand.u32 2147483648, %v4011_v23  ;;  %v788_v14 = vsel %vm3995_vm13, %v787_v46, %v783_v2 }
 0x21c   :  { %v734_v12 = vadd.f32 %v2787_v11, %v733_v40  ;;  %v678_v17 = vsel %vm4045_vm4, %v3980_v7, %v674_v18  ;;  %2798 = vtanh.f32 %v604_v6  ;;  %v682_v59 = vor.u32 1.1754944e-38, %v681_v1 }
 0x21d   :  { %v601_v16 = vadd.f32 %v2395_v33, %v576_v41  ;;  %v594_v61 = vadd.f32 %v2380_v44, %v558_v58  ;;  %v598_v60 = vadd.f32 %v2388_v63, %v568_v26  ;;  %v2793_v46 = vpop.eup %2792  ;;  %v792_v25 = vsub.f32 1.0, %v791_v50 }
 0x21e   :  { %v738_v28 = vsel %vm737_vm8, %v2787_v11, %v734_v12  ;;  %vm740_vm9 = vcmp.eq.f32.partialorder %v739_v42, 8.507059e+37  ;;  %v2403_v7 = vunpack.c.l.bf16 %v4053_v13  ;;  %v686_v22 = vmul.f32 %v2793_v46, %v4009_v21  ;;  %v586_v11 = vpop.f32.mrf.mxu3  ;;  %v578_v42 = vpop.f32.mrf.mxu2 }
 0x21f   :  { %vm750_vm10 = vweird.f32 %v4011_v23  ;;  %v743_v15 = vsel %vm740_vm9, %v742_v49, %v738_v28  ;;  %v2169_v27 = vmul.f32 -1.442695, %v601_v16  ;;  %v2162_v33 = vmul.f32 -1.442695, %v594_v61 }
 0x220   :  { %v2795_v6 = vpop.eup %2794  ;;  %vm795_vm11 = vweird.f32 %v3978_v5  ;;  %v683_v24 = vsel %vm4049_vm5, %v682_v59, %v678_v17  ;;  %v840_v44 = vmul.f32 0.0, %v743_v15  ;;  %v2166_v63 = vmul.f32 -1.442695, %v598_v60 }
 0x221   :  { %v2797_v8 = vpop.eup %2796  ;;  %v855_v20 = vmul.f32 %v2795_v6, %v788_v14  ;;  %v687_v4 = vsub.f32 1.0, %v686_v22  ;;  %2800 = vpow2.f32 %v2169_v27  ;;  %v605_v1 = vadd.f32 %v2403_v7, %v586_v11 }
 0x222   :  { %v746_v18 = vmul.f32 %v2797_v8, %v4011_v23  ;;  %v2799_v2 = vpop.eup %2798  ;;  %v793_v41 = vmul.f32 %v4016_v55, %v792_v25  ;;  %vm796_vm12 = vweird.f32 %v4016_v55  ;;  %2802 = vpow2.f32 %v2162_v33 }
 0x223   :  { %v4077_v40 = vsel %vm3967_vm7, %v855_v20, 0.0   ;;  %v844_v50 = vmul.f32 %v2799_v2, %v683_v24  ;;  %2804 = vpow2.f32 %v2166_v63  ;;  %vm690_vm13 = vweird.f32 %v4009_v21  ;;  %vm4108_vm4 = vmor %vm795_vm11, %vm796_vm12 }
 0x224   :  { %v747_v49 = vsub.f32 1.0, %v746_v18  ;;  %v688_v58 = vmul.f32 %v2793_v46, %v687_v4  ;;  %vm691_vm14 = vweird.f32 %v2793_v46  ;;  %v694_v26 = vand.u32 2147483647, %v4009_v21 }
 0x225   :  { %v696_v53 = vand.u32 2147483648, %v4009_v21  ;;  %v848_v12 = vadd.f32 %v844_v50, %v840_v44  ;;  %vm751_vm15 = vweird.f32 %v2797_v8  ;;  %2806 = vtanh.f32 %v605_v1  ;;  %vm692_vm0 = vmor %vm690_vm13, %vm691_vm14 }
 0x226   :  { %v748_v3 = vmul.f32 %v2797_v8, %v747_v49  ;;  %v794_v14 = vadd.f32 %v4016_v55, %v793_v41  ;;  %v689_v17 = vadd.f32 %v2793_v46, %v688_v58  ;;  %v754_v59 = vand.u32 2147483647, %v4011_v23  ;;  %vm4100_vm3 = vmor %vm750_vm10, %vm751_vm15  ;;  %v588_v49 = vpop.f32.mrf.mxu3 }
 0x227   :  { %v602_v16 = vadd.f32 %v2396_v43, %v578_v42  ;;  %v2801_v61 = vpop.eup %2800  ;;  %2808 = vtanh.f32 %v848_v12  ;;  %v4090_v60 = vsel %vm3967_vm7, %v848_v12, 0.0   ;;  %v697_v25 = vor.u32 1.1754944e-38, %v696_v53 }
 0x228   :  { %v749_v28 = vadd.f32 %v2797_v8, %v748_v3  ;;  %v2803_v7 = vpop.eup %2802  ;;  %v799_v6 = vand.u32 2147483647, %v3978_v5  ;;  %v4095_v22 = vadd.f32 1.0, %v2801_v61  ;;  %v693_v15 = vsel %vm692_vm0, %v2793_v46, %v689_v17 }
 0x229   :  { %vm695_vm2 = vcmp.eq.f32.partialorder %v694_v26, 8.507059e+37  ;;  %v2805_v43 = vpop.eup %2804  ;;  %v757_v46 = vor.u32 1.1754944e-38, %v756_v0  ;;  %v4114_v27 = vadd.f32 1.0, %v2803_v7  ;;  %v798_v24 = vsel %vm4108_vm4, %v4016_v55, %v794_v14 }
 0x22a   :  { %v698_v33 = vsel %vm695_vm2, %v697_v25, %v693_v15  ;;  %v753_v20 = vsel %vm4100_vm3, %v2797_v8, %v749_v28  ;;  %2810 = vrcp.f32 %v4095_v22  ;;  %vm755_vm5 = vcmp.eq.f32.partialorder %v754_v59, 8.507059e+37 }
 0x22b   :  { %v2170_v44 = vmul.f32 -1.442695, %v602_v16  ;;  %v2807_v63 = vpop.eup %2806  ;;  %v802_v11 = vor.u32 1.1754944e-38, %v801_v62  ;;  %2812 = vrcp.f32 %v4114_v27  ;;  %v4125_v23 = vadd.f32 1.0, %v2805_v43 }
 0x22c   :  { %v758_v0 = vsel %vm755_vm5, %v757_v46, %v753_v20  ;;  %vm800_vm6 = vcmp.eq.f32.partialorder %v799_v6, 8.507059e+37  ;;  %v845_v8 = vmul.f32 %v2807_v63, %v698_v33  ;;  %v2404_v55 = vunpack.c.h.bf16 %v4053_v13 }
 0x22d   :  { %v841_v4 = vmul.f32 0.0, %v758_v0  ;;  %v2809_v18 = vpop.eup %2808  ;;  %v803_v1 = vsel %vm800_vm6, %v802_v11, %v798_v24  ;;  %2814 = vrcp.f32 %v4125_v23  ;;  %v816_v50 = vand.u32 2147483648, %v4095_v22 }
 0x22e   :  { %v856_v2 = vmul.f32 %v2809_v18, %v803_v1  ;;  %2816 = vpow2.f32 %v2170_v44  ;;  %v606_v53 = vadd.f32 %v2404_v55, %v588_v49  ;;  %vm810_vm8 = vweird.f32 %v4095_v22 }
 0x22f   :  { %v849_v41 = vadd.f32 %v845_v8, %v841_v4  ;;  %v814_v14 = vand.u32 2147483647, %v4095_v22  ;;  %v817_v59 = vor.u32 1.1754944e-38, %v816_v50  ;;  %v711_v25 = vand.u32 2147483648, %v4114_v27 }
 0x230   :  { %v2811_v5 = vpop.eup %2810  ;;  %v4131_v62 = vsel %vm3967_vm7, %v856_v2, 0.0   ;;  %v709_v48 = vand.u32 2147483647, %v4114_v27  ;;  %v771_v21 = vand.u32 2147483648, %v4125_v23  ;;  %vm705_vm11 = vweird.f32 %v4114_v27 }
 0x231   :  { %v4136_v42 = vsel %vm3967_vm7, %v849_v41, 0.0   ;;  %v2813_v58 = vpop.eup %2812  ;;  %v806_v26 = vmul.f32 %v2811_v5, %v4095_v22  ;;  %2818 = vtanh.f32 %v849_v41  ;;  %vm811_vm9 = vweird.f32 %v2811_v5 }
 0x232   :  { %v701_v13 = vmul.f32 %v2813_v58, %v4114_v27  ;;  %2820 = vtanh.f32 %v606_v53  ;;  %vm706_vm10 = vweird.f32 %v2813_v58  ;;  %vm812_vm12 = vmor %vm810_vm8, %vm811_vm9  ;;  %v769_v24 = vand.u32 2147483647, %v4125_v23 }
 0x233   :  { %v2815_v3 = vpop.eup %2814  ;;  %v807_v12 = vsub.f32 1.0, %v806_v26  ;;  %vm815_vm14 = vcmp.eq.f32.partialorder %v814_v14, 8.507059e+37  ;;  %vm765_vm15 = vweird.f32 %v4125_v23  ;;  %vm707_vm0 = vmor %vm705_vm11, %vm706_vm10  ;;  %v712_v63 = vor.u32 1.1754944e-38, %v711_v25 }
 0x234   :  { %v2817_v17 = vpop.eup %2816  ;;  %v702_v16 = vsub.f32 1.0, %v701_v13  ;;  %v761_v61 = vmul.f32 %v2815_v3, %v4125_v23  ;;  %vm766_vm13 = vweird.f32 %v2815_v3  ;;  %vm710_vm2 = vcmp.eq.f32.partialorder %v709_v48, 8.507059e+37 }
 0x235   :  { %v808_v28 = vmul.f32 %v2811_v5, %v807_v12  ;;  %v654_v7 = vadd.f32 1.0, %v2817_v17  ;;  %v772_v8 = vor.u32 1.1754944e-38, %v771_v21  ;;  %vm767_vm3 = vmor %vm765_vm15, %vm766_vm13  ;;  %vm770_vm4 = vcmp.eq.f32.partialorder %v769_v24, 8.507059e+37 }
 0x236   :  { %v762_v6 = vsub.f32 1.0, %v761_v61  ;;  %v703_v15 = vmul.f32 %v2813_v58, %v702_v16  ;;  %v4170_v48 = vmov 0.0   ;;  %v4174_v21 = vmov 0.0  }
 0x237   :  { %v809_v43 = vadd.f32 %v2811_v5, %v808_v28  ;;  %2822 = vrcp.f32 %v654_v7  ;;  %v2819_v46 = vpop.eup %2818  ;;  %v831_v26 = vand.u32 2147483648, %v654_v7  ;;  %v829_v12 = vand.u32 2147483647, %v654_v7 }
 0x238   :  { %v763_v33 = vmul.f32 %v2815_v3, %v762_v6  ;;  %v704_v20 = vadd.f32 %v2813_v58, %v703_v15  ;;  %v2821_v4 = vpop.eup %2820  ;;  %vm825_vm6 = vweird.f32 %v654_v7  ;;  %v4162_v28 = vmov 0.0  }
 0x239   :  { %v813_v44 = vsel %vm812_vm12, %v2811_v5, %v809_v43  ;;  %v832_v17 = vor.u32 1.1754944e-38, %v831_v26  ;;  %vm830_vm9 = vcmp.eq.f32.partialorder %v829_v12, 8.507059e+37  ;;  %v4164_v6 = vmov 0.0  }
 0x23a   :  { %v818_v11 = vsel %vm815_vm14, %v817_v59, %v813_v44  ;;  %v708_v0 = vsel %vm707_vm0, %v2813_v58, %v704_v20  ;;  %v764_v27 = vadd.f32 %v2815_v3, %v763_v33  ;;  %v4166_v15 = vmov 0.0  }
 0x23b   :  { %v857_v22 = vmul.f32 %v2819_v46, %v818_v11  ;;  %v713_v18 = vsel %vm710_vm2, %v712_v63, %v708_v0  ;;  %v4172_v43 = vmov 0.0   ;;  %v5463_v33 = vmov %v4136_v42 }
 0x23c   :  { %v768_v1 = vsel %vm767_vm3, %v2815_v3, %v764_v27  ;;  %v846_v55 = vmul.f32 %v2821_v4, %v713_v18  ;;  %v5464_v20 = vmov %v4090_v60  ;;  %v5465_v24 = vmov %v4033_v47 }
 0x23d   :  { %v2823_v2 = vpop.eup %2822  ;;  %v865_v23 = vsel %vm3967_vm7, %v857_v22, 0.0   ;;  %v773_v41 = vsel %vm770_vm4, %v772_v8, %v768_v1  ;;  %v5468_v11 = vmov %v4131_v62  ;;  %v5469_v0 = vmov %v4077_v40 }
 0x23e   :  { %v821_v49 = vmul.f32 %v2823_v2, %v654_v7  ;;  %v842_v5 = vmul.f32 0.0, %v773_v41  ;;  %vm826_vm5 = vweird.f32 %v2823_v2  ;;  %v4168_v7 = vmov 0.0  }
 0x23f   :  { %vm827_vm8 = vmor %vm825_vm6, %vm826_vm5  ;;  %v5467_v63 = vmov %v865_v23 }
 0x240   :  { %v822_v50 = vsub.f32 1.0, %v821_v49  ;;  %v850_v58 = vadd.f32 %v846_v55, %v842_v5 }
 0x242   :  { %v823_v53 = vmul.f32 %v2823_v2, %v822_v50  ;;  %2824 = vtanh.f32 %v850_v58  ;;  %v870_v13 = vsel %vm3967_vm7, %v850_v58, 0.0  }
 0x243   :  { %v5462_v46 = vmov %v870_v13 }
 0x244   :  { %v824_v3 = vadd.f32 %v2823_v2, %v823_v53 }
 0x246   :  { %v828_v14 = vsel %vm827_vm8, %v2823_v2, %v824_v3 }
 0x247   :  { %v833_v16 = vsel %vm830_vm9, %v832_v17, %v828_v14 }
 0x248   :  { %v2825_v59 = vpop.eup %2824  ;;  %2031 = sbr.rel (%p2171_p2) target bundleno = 888 (0x378), region = 70 }
 0x249   :  { %v858_v61 = vmul.f32 %v2825_v59, %v833_v16 }
 0x24b   :  { %v866_v25 = vsel %vm3967_vm7, %v858_v61, 0.0  }
 0x24c   :  { %v5466_v44 = vmov %v866_v25 }
 0x24d   :  { %v4203_v27 = vmov 0.0   ;;  %v4205_v4 = vmov 0.0   ;;  %v4207_v8 = vmov 0.0   ;;  %v4209_v22 = vmov 0.0  }
 0x24e   :  { %v4211_v18 = vmov 0.0   ;;  %v4213_v1 = vmov 0.0   ;;  %v4215_v55 = vmov 0.0   ;;  %v4217_v2 = vmov 0.0  }
 0x24f LB: > { %v5470_v57 = vld [vmem:[#allocation15_spill] sm:$0xff]  ;;  %5471 = vst [vmem:[#allocation66_spill] sm:$0xff] %v3152_v18  ;;  %v900_v41 = vpack.c.bf16 %v3156_v1, %v3156_v1  ;;  %v901_v49 = vpack.c.bf16 %v3152_v18, %v3152_v18  ;;  %v896_v5 = vpack.c.bf16 %v3188_v23, %v3188_v23  ;;  %v897_v50 = vpack.c.bf16 %v3184_v25, %v3184_v25  ;;  %v5474_v34 = vld [vmem:[#allocation5_spill] sm:$0xff]  ;;  %v5475_v38 = vld [vmem:[#allocation20_spill] sm:$0xff]  ;;  %s2332_s11 = sshll.u32 %s3200_s10, 6  ;;  %s2172_s13 = sadd.s32 4294967295, %s3200_s10  ;;  %v3136_v27 = vphi %v4203_v27, %v5601_v27   ;;  %s3200_s10 = sphi %s4240_s10, %s874_s10   ;;  %v3196_v40 = vphi %v4077_v40, %v5616_v40   ;;  %v3192_v62 = vphi %v4131_v62, %v5615_v62   ;;  %v3188_v23 = vphi %v865_v23, %v5614_v23   ;;  %v3184_v25 = vphi %v866_v25, %v5613_v25   ;;  %v3180_v47 = vphi %v4033_v47, %v5612_v47   ;;  %v3176_v60 = vphi %v4090_v60, %v5611_v60   ;;  %v3172_v42 = vphi %v4136_v42, %v5610_v42   ;;  %v3168_v13 = vphi %v870_v13, %v5609_v13   ;;  %v3164_v2 = vphi %v4217_v2, %v5608_v2   ;;  %v3160_v55 = vphi %v4215_v55, %v5607_v55   ;;  %v3156_v1 = vphi %v4213_v1, %v5606_v1   ;;  %v3152_v18 = vphi %v4211_v18, %v5605_v18   ;;  %v3148_v22 = vphi %v4209_v22, %v5604_v22   ;;  %v3144_v8 = vphi %v4207_v8, %v5603_v8   ;;  %v3140_v4 = vphi %v4205_v4, %v5602_v4  }
 0x250   : > { %5472 = vst [vmem:[#allocation67_spill] sm:$0xff] %v3192_v62  ;;  %v898_v17 = vpack.c.bf16 %v3164_v2, %v3164_v2  ;;  %v899_v59 = vpack.c.bf16 %v3160_v55, %v3160_v55  ;;  %v894_v16 = vpack.c.bf16 %v3196_v40, %v3196_v40  ;;  %v895_v61 = vpack.c.bf16 %v3192_v62, %v3192_v62  ;;  %v5476_v30 = vld [vmem:[#allocation29_spill] sm:$0xff]  ;;  %v5477_v32 = vld [vmem:[#allocation31_spill] sm:$0xff]  ;;  %v5480_v36 = vld [vmem:[#allocation18_spill] sm:$0xff]  ;;  %s4350_s12 = scalar_lea.vmem [#allocation2], %s2332_s11 }
 0x251   : > { %5473 = vst [vmem:[#allocation68_spill] sm:$0xff] %v3196_v40  ;;  %v920_v58 = vunpack.c.l.b16 %v900_v41  ;;  %v921_v26 = vunpack.c.l.b16 %v901_v49  ;;  %v908_v53 = vunpack.c.l.b16 %v896_v5  ;;  %v909_v12 = vunpack.c.l.b16 %v897_v50  ;;  %v5478_v56 = vld [vmem:[#allocation47_spill] sm:$0xff]  ;;  %v5479_v54 = vld [vmem:[#allocation49_spill] sm:$0xff]  ;;  %v5486_v9 = vld [vmem:[#allocation6_spill] sm:$0xff] }
 0x252   : > { %v918_v28 = vunpack.c.l.b16 %v898_v17  ;;  %v919_v6 = vunpack.c.l.b16 %v899_v59  ;;  %v906_v15 = vunpack.c.l.b16 %v894_v16  ;;  %v907_v7 = vunpack.c.l.b16 %v895_v61  ;;  %v5481_v35 = vld [vmem:[#allocation17_spill] sm:$0xff]  ;;  %v5483_v31 = vld [vmem:[#allocation35_spill] sm:$0xff]  ;;  %v5497_v10 = vld [vmem:[#allocation16_spill] sm:$0xff] }
 0x253   : > { %v923_v3 = vpack.c.b16 %v921_v26, %v920_v58  ;;  %v911_v14 = vpack.c.b16 %v909_v12, %v908_v53  ;;  %v2176_v21 = vor.u32 %v5477_v32, %v5476_v30  ;;  %v2192_v51 = vor.u32 %v5479_v54, %v5478_v56  ;;  %v5482_v29 = vld [vmem:[#allocation33_spill] sm:$0xff]  ;;  %v5484_v19 = vld [vmem:[#allocation51_spill] sm:$0xff] }
 0x254   : > { %v922_v48 = vpack.c.b16 %v919_v6, %v918_v28  ;;  %v910_v43 = vpack.c.b16 %v907_v7, %v906_v15  ;;  %vm966_vm7 = vcmask 523264   ;;  %v2180_v46 = vor.u32 %v5483_v31, %v5482_v29  ;;  %v5485_v45 = vld [vmem:[#allocation53_spill] sm:$0xff]  ;;  %v5489_v24 = vld [vmem:[#allocation39_spill] sm:$0xff] }
 0x255   : > { %995 = vmatpush.bf16.msra.mxu0 %v923_v3  ;;  %2467 = vmatpush.bf16.msra.mxu2 %v923_v3  ;;  %v2196_v33 = vor.u32 %v5485_v45, %v5484_v19  ;;  %v5487_v39 = vld [vmem:[#allocation21_spill] sm:$0xff]  ;;  %v5490_v63 = vld [vmem:[#allocation55_spill] sm:$0xff]  ;;  %v2455_v3 = vld [vmem:[%s4350_s12 + $0x28] sm:$0xff]  }
 0x256   : > { %1346 = vmatpush.bf16.msra.mxu1 %v911_v14  ;;  %2471 = vmatpush.bf16.msra.mxu3 %v911_v14  ;;  %v5488_v20 = vld [vmem:[#allocation37_spill] sm:$0xff]  ;;  %v5492_v37 = vld [vmem:[#allocation19_spill] sm:$0xff]  ;;  %v2427_v59 = vunpack.c.l.bf16 %v2455_v3 }
 0x257   : > { %v2184_v44 = vor.u32 %v5489_v24, %v5488_v20  ;;  %v5491_v11 = vld [vmem:[#allocation57_spill] sm:$0xff]  ;;  %v5495_v52 = vld [vmem:[#allocation59_spill] sm:$0xff] }
 0x258   : > { %v2200_v0 = vor.u32 %v5491_v11, %v5490_v63  ;;  %v5493_v41 = vld [vmem:[#allocation41_spill] sm:$0xff] }
 0x259   : > { %996 = vmatpush.bf16.msra.mxu0 %v922_v48  ;;  %2468 = vmatpush.bf16.msra.mxu2 %v922_v48  ;;  %v5494_v49 = vld [vmem:[#allocation45_spill] sm:$0xff]  ;;  %v5498_v48 = vld [vmem:[#allocation11_spill] sm:$0xff] }
 0x25a   : > { %1347 = vmatpush.bf16.msra.mxu1 %v910_v43  ;;  %2472 = vmatpush.bf16.msra.mxu3 %v910_v43  ;;  %v2188_v5 = vor.u32 %v5494_v49, %v5493_v41  ;;  %v5496_v50 = vld [vmem:[#allocation61_spill] sm:$0xff]  ;;  %v5499_v41 = vld [vmem:[#allocation44_spill] sm:$0xff] }
 0x25b   : > { %v2204_v58 = vor.u32 %v5496_v50, %v5495_v52  ;;  %v2406_v26 = vld [vmem:[%s4350_s12] sm:$0xff]  }
 0x25c   : > { %v2407_v53 = vunpack.c.l.bf16 %v2406_v26  ;;  %v2408_v16 = vunpack.c.h.bf16 %v2406_v26 }
 0x25d   : > { %2227 = vmatmul.msk.bf16.vlgmr.msra.gmra.mxu1 %vm517_vm1, %v5474_v34  ;;  %2232 = vmatmul.msk.bf16.vlgmr.msra.gmra.mxu3 %vm517_vm1, %v5475_v38 }
 0x25e   : > { %997 = vmatpush.bf16.msra.mxu0 %v911_v14  ;;  %2469 = vmatpush.bf16.msra.mxu2 %v911_v14 }
 0x262   : > { %998 = vmatpush.bf16.msra.mxu0 %v910_v43  ;;  %2470 = vmatpush.bf16.msra.mxu2 %v910_v43 }
 0x265   : > { %2205 = vmatmul.msk.bf16.vlgmr.msra.gmra.mxu0 %vm966_vm7, %v2176_v21  ;;  %2209 = vmatmul.msk.bf16.vlgmr.msra.gmra.mxu2 %vm966_vm7, %v2192_v51 }
 0x26d   : > { %2228 = vmatmul.msk.bf16.gmra.mxu1 %vm517_vm1, %v5480_v36  ;;  %2233 = vmatmul.msk.bf16.gmra.mxu3 %vm517_vm1, %v5481_v35 }
 0x275   : > { %2206 = vmatmul.msk.bf16.gmra.mxu0 %vm966_vm7, %v2180_v46  ;;  %2210 = vmatmul.msk.bf16.gmra.mxu2 %vm966_vm7, %v2196_v33  ;;  %v2428_v46 = vunpack.c.h.bf16 %v2455_v3  ;;  %v4356_v33 = vld [vmem:[%s4350_s12 + $0x8] sm:$0xff]   ;;  %v5500_v3 = vld [vmem:[#allocation7_spill] sm:$0xff] }
 0x27d   : > { %2229 = vmatmul.msk.bf16.gmra.mxu1 %vm517_vm1, %v5486_v9  ;;  %2234 = vmatmul.msk.bf16.gmra.mxu3 %vm517_vm1, %v5487_v39 }
 0x285   : > { %2207 = vmatmul.msk.bf16.gmra.mxu0 %vm966_vm7, %v2184_v44  ;;  %2211 = vmatmul.msk.bf16.gmra.mxu2 %vm966_vm7, %v2200_v0  ;;  %v2411_v0 = vunpack.c.l.bf16 %v4356_v33 }
 0x28d   : > { %2230 = vmatmul.msk.bf16.gmra.mxu1 %vm517_vm1, %v5492_v37 }
 0x295   : > { %2208 = vmatmul.msk.bf16.gmra.mxu0 %vm966_vm7, %v2188_v5  ;;  %2212 = vmatmul.msk.bf16.gmra.mxu2 %vm966_vm7, %v2204_v58 }
 0x29d   : > { %2231 = vmatmul.msk.bf16.gmra.mxu1 %vm517_vm1, %v5497_v10 }
 0x2da   : > { %v1349_v12 = vpop.f32.mrf.mxu1 }
 0x2db   : > { %v1389_v14 = vadd.f32 %v2407_v53, %v1349_v12 }
 0x2dd   : > { %v2235_v17 = vmul.f32 -1.442695, %v1389_v14 }
 0x2df   : > { %2826 = vpow2.f32 %v2235_v17 }
 0x2e0   : > { %v1374_v61 = vpop.f32.mrf.mxu3 }
 0x2e1   : > { %v1399_v28 = vadd.f32 %v2427_v59, %v1374_v61  ;;  %v1292_v61 = vstv %s2172_s13 }
 0x2e2   : > { %v1000_v6 = vpop.f32.mrf.mxu0  ;;  %v1351_v15 = vpop.f32.mrf.mxu1  ;;  %vm1293_vm10 = vcmp.gt.s32.totalorder %v5470_v57, %v1292_v61 }
 0x2e3   : > { %v2245_v7 = vmul.f32 -1.442695, %v1399_v28  ;;  %v1001_v43 = vadd.f32 %v1000_v6, %v5498_v48  ;;  %v1390_v21 = vadd.f32 %v2408_v16, %v1351_v15  ;;  %v1657_v15 = vstv %s3200_s10  ;;  %s874_s10 = sadd.s32 1, %s3200_s10  }
 0x2e4   : > { %vm1658_vm11 = vcmp.gt.s32.totalorder %v5470_v57, %v1657_v15  ;;  %p5071_p3 = scmp.ge.s32.totalorder %s874_s10, %s5340_s0 }
 0x2e5   : > { %v2827_v51 = vpop.eup %2826  ;;  %2828 = vpow2.f32 %v2245_v7  ;;  %v2236_v24 = vmul.f32 -1.442695, %v1390_v21  ;;  %v2213_v44 = vmul.f32 -1.442695, %v1001_v43 }
 0x2e6   : > { %v4358_v20 = vadd.f32 1.0, %v2827_v51  ;;  %v5501_v51 = vld [vmem:[#allocation43_spill] sm:$0xff] }
 0x2e8   : > { %2830 = vrcp.f32 %v4358_v20  ;;  %v1020_v63 = vpop.f32.mrf.mxu2  ;;  %v1376_v11 = vpop.f32.mrf.mxu3  ;;  %vm1458_vm12 = vweird.f32 %v4358_v20 }
 0x2e9   : > { %v1021_v49 = vadd.f32 %v1020_v63, %v5499_v41  ;;  %v1400_v5 = vadd.f32 %v2428_v46, %v1376_v11  ;;  %2832 = vpow2.f32 %v2236_v24  ;;  %v4376_v24 = vld [vmem:[%s4350_s12 + $0x30] sm:$0xff]  }
 0x2ea   : > { %v1002_v50 = vpop.f32.mrf.mxu0  ;;  %v1354_v58 = vpop.f32.mrf.mxu1  ;;  %2834 = vpow2.f32 %v2213_v44 }
 0x2eb   : > { %v2829_v26 = vpop.eup %2828  ;;  %v2221_v53 = vmul.f32 -1.442695, %v1021_v49  ;;  %v2246_v12 = vmul.f32 -1.442695, %v1400_v5  ;;  %v1003_v14 = vadd.f32 %v1002_v50, %v5500_v3  ;;  %v1391_v59 = vadd.f32 %v2411_v0, %v1354_v58 }
 0x2ec   : > { %v4365_v17 = vadd.f32 1.0, %v2829_v26  ;;  %v3267_v50 = vmov 0  }
 0x2ed   : > { %2836 = vpow2.f32 %v2221_v53  ;;  %v2214_v28 = vmul.f32 -1.442695, %v1003_v14  ;;  %v2237_v7 = vmul.f32 -1.442695, %v1391_v59  ;;  %v4387_v58 = vsel %vm1293_vm10, 1, %v3267_v50 }
 0x2ee   : > { %v4367_v16 = vpop.eup %2830  ;;  %2838 = vrcp.f32 %v4365_v17  ;;  %v2431_v53 = vunpack.c.l.bf16 %v4376_v24  ;;  %v1462_v14 = vand.u32 2147483647, %v4358_v20  ;;  %vm1608_vm14 = vweird.f32 %v4365_v17 }
 0x2ef   : > { %2840 = vpow2.f32 %v2246_v12  ;;  %v2833_v6 = vpop.eup %2832  ;;  %v1454_v21 = vmul.f32 %v4367_v16, %v4358_v20  ;;  %v4390_v12 = vsel %vm1658_vm11, 1, %v3267_v50  ;;  %vm1459_vm15 = vweird.f32 %v4367_v16 }
 0x2f0   : > { %v1022_v48 = vpop.f32.mrf.mxu2  ;;  %v2835_v43 = vpop.eup %2834  ;;  %v4379_v63 = vadd.f32 1.0, %v2833_v6  ;;  %2842 = vpow2.f32 %v2214_v28  ;;  %v1464_v28 = vand.u32 2147483648, %v4358_v20  ;;  %vm4412_vm13 = vcmp.eq.f32.partialorder %v1462_v14, 8.507059e+37  ;;  %vm4452_vm0 = vmor %vm1458_vm12, %vm1459_vm15 }
 0x2f1   : > { %v1023_v46 = vadd.f32 %v1022_v48, %v5501_v51  ;;  %v4383_v41 = vadd.f32 1.0, %v2835_v43  ;;  %2844 = vpow2.f32 %v2237_v7  ;;  %v1455_v26 = vsub.f32 1.0, %v1454_v21  ;;  %v1379_v3 = vpop.f32.mrf.mxu3  ;;  %v4403_v7 = vld [vmem:[%s4350_s12 + $0x10] sm:$0xff]  }
 0x2f2   : > { %v1005_v15 = vpop.f32.mrf.mxu0  ;;  %v1401_v43 = vadd.f32 %v2431_v53, %v1379_v3  ;;  %v2412_v51 = vunpack.c.h.bf16 %v4356_v33  ;;  %v1465_v53 = vor.u32 1.1754944e-38, %v1464_v28  ;;  %vm1473_vm8 = vweird.f32 %v4379_v63 }
 0x2f3   : > { %v2837_v44 = vpop.eup %2836  ;;  %v2222_v11 = vmul.f32 -1.442695, %v1023_v46  ;;  %v1456_v21 = vmul.f32 %v4367_v16, %v1455_v26  ;;  %v5504_v26 = vld [vmem:[#allocation14_spill] sm:$0xff] }
 0x2f4   : > { %v4381_v0 = vpop.eup %2838  ;;  %v4385_v49 = vadd.f32 1.0, %v2837_v44  ;;  %v1006_v3 = vadd.f32 %v1005_v15, %v5504_v26  ;;  %v1612_v44 = vand.u32 2147483647, %v4365_v17 }
 0x2f5   : > { %v2841_v5 = vpop.eup %2840  ;;  %2846 = vpow2.f32 %v2222_v11  ;;  %v1604_v59 = vmul.f32 %v4381_v0, %v4365_v17  ;;  %v1614_v11 = vand.u32 2147483648, %v4365_v17  ;;  %v1457_v14 = vadd.f32 %v4367_v16, %v1456_v21 }
 0x2f6   : > { %2848 = vrcp.f32 %v4385_v49  ;;  %v4397_v61 = vadd.f32 1.0, %v2841_v5  ;;  %v2843_v48 = vpop.eup %2842  ;;  %v1356_v5 = vpop.f32.mrf.mxu1  ;;  %v2215_v31 = vmul.f32 -1.442695, %v1006_v3  ;;  %vm1609_vm2 = vweird.f32 %v4381_v0 }
 0x2f7   : > { %2850 = vrcp.f32 %v4379_v63  ;;  %v2845_v46 = vpop.eup %2844  ;;  %v1605_v9 = vsub.f32 1.0, %v1604_v59  ;;  %v4422_v29 = vadd.f32 1.0, %v2843_v48  ;;  %v1392_v28 = vadd.f32 %v2412_v51, %v1356_v5  ;;  %vm4483_vm5 = vmor %vm1608_vm14, %vm1609_vm2 }
 0x2f8   : > { %2852 = vrcp.f32 %v4383_v41  ;;  %v1025_v15 = vpop.f32.mrf.mxu2  ;;  %v4432_v33 = vor.u32 1.1754944e-38, %v1614_v11  ;;  %v4436_v48 = vadd.f32 1.0, %v2845_v46  ;;  %v1219_v5 = vand.u32 2147483648, %v4385_v49 }
 0x2f9   : > { %2854 = vrcp.f32 %v4397_v61  ;;  %v1606_v21 = vmul.f32 %v4381_v0, %v1605_v9  ;;  %v5507_v9 = vld [vmem:[#allocation10_spill] sm:$0xff]  ;;  %v1461_v32 = vsel %vm4452_vm0, %v4367_v16, %v1457_v14  ;;  %v2238_v34 = vmul.f32 -1.442695, %v1392_v28  ;;  %v1381_v46 = vpop.f32.mrf.mxu3 }
 0x2fa   : > { %2856 = vtanh.f32 %v1401_v43  ;;  %v1477_v43 = vand.u32 2147483647, %v4379_v63  ;;  %v1026_v3 = vadd.f32 %v1025_v15, %v5507_v9  ;;  %vm4471_vm3 = vcmp.eq.f32.partialorder %v1612_v44, 8.507059e+37 }
 0x2fb   : > { %v2847_v6 = vpop.eup %2846  ;;  %v4469_v15 = vadd.f32 %v4381_v0, %v1606_v21  ;;  %vm1213_vm4 = vweird.f32 %v4385_v49  ;;  %v1217_v16 = vand.u32 2147483647, %v4385_v49  ;;  %v4487_v44 = vor.u32 1.1754944e-38, %v1219_v5 }
 0x2fc   : > { %v4418_v19 = vpop.eup %2848  ;;  %v4424_v50 = vadd.f32 1.0, %v2847_v6  ;;  %v2223_v36 = vmul.f32 -1.442695, %v1026_v3  ;;  %v1466_v21 = vsel %vm4412_vm13, %v1465_v53, %v1461_v32  ;;  %v1007_v3 = vpop.f32.mrf.mxu0  ;;  %vm1623_vm6 = vweird.f32 %v4397_v61 }
 0x2fd   : > { %v4426_v59 = vpop.eup %2850  ;;  %v1209_v30 = vmul.f32 %v4418_v19, %v4385_v49  ;;  %v1627_v38 = vand.u32 2147483647, %v4397_v61  ;;  %v1629_v5 = vand.u32 2147483648, %v4397_v61  ;;  %v1611_v10 = vsel %vm4483_vm5, %v4381_v0, %v4469_v15 }
 0x2fe   : > { %v4430_v26 = vpop.eup %2852  ;;  %2858 = vrcp.f32 %v4424_v50  ;;  %v1469_v11 = vmul.f32 %v4426_v59, %v4379_v63  ;;  %vm1214_vm9 = vweird.f32 %v4418_v19  ;;  %vm4513_vm7 = vcmp.eq.f32.partialorder %v1217_v16, 8.507059e+37 }
 0x2ff   : > { %v4439_v6 = vpop.eup %2854  ;;  %2860 = vrcp.f32 %v4422_v29  ;;  %v4465_v35 = vmul.f32 %v4430_v26, %v4383_v41  ;;  %v1210_v20 = vsub.f32 1.0, %v1209_v30  ;;  %v1232_v30 = vand.u32 2147483647, %v4424_v50  ;;  %vm4548_vm14 = vmor %vm1213_vm4, %vm1214_vm9 }
 0x300   : > { %v1619_v51 = vmul.f32 %v4439_v6, %v4397_v61  ;;  %2862 = vrcp.f32 %v4436_v48  ;;  %v2857_v37 = vpop.eup %2856  ;;  %v1470_v28 = vsub.f32 1.0, %v1469_v11  ;;  %v1027_v45 = vpop.f32.mrf.mxu2  ;;  %vm1624_vm10 = vweird.f32 %v4439_v6 }
 0x301   : > { %2864 = vpow2.f32 %v2215_v31  ;;  %v1211_v11 = vmul.f32 %v4418_v19, %v1210_v20  ;;  %v1359_v20 = vpop.f32.mrf.mxu1  ;;  %vm4522_vm11 = vcmp.eq.f32.partialorder %v1627_v38, 8.507059e+37  ;;  %vm4531_vm12 = vcmp.eq.f32.partialorder %v1477_v43, 8.507059e+37  ;;  %v5521_v38 = vld [vmem:[#allocation63_spill] sm:$0xff]  ;;  %vm4568_vm15 = vmor %vm1623_vm6, %vm1624_vm10 }
 0x302   : > { %2866 = vpow2.f32 %v2223_v36  ;;  %v1620_v31 = vsub.f32 1.0, %v1619_v51  ;;  %v4505_v36 = vmul.f32 %v2857_v37, %v1466_v21  ;;  %v5513_v51 = vld [vmem:[#allocation13_spill] sm:$0xff]  ;;  %v1234_v37 = vand.u32 2147483648, %v4424_v50 }
 0x303   : > { %2868 = vpow2.f32 %v2238_v34  ;;  %v5512_v34 = vunpack.c.h.bf16 %v4376_v24  ;;  %v1008_v39 = vadd.f32 %v1007_v3, %v5513_v51  ;;  %v1471_v0 = vmul.f32 %v4426_v59, %v1470_v28 }
 0x304   : > { %v4477_v14 = vpop.eup %2858  ;;  %v1621_v15 = vmul.f32 %v4439_v6, %v1620_v31  ;;  %v5520_v31 = vunpack.c.l.bf16 %v4403_v7  ;;  %v1028_v57 = vadd.f32 %v1027_v45, %v5521_v38  ;;  %vm1474_vm13 = vweird.f32 %v4426_v59 }
 0x305   : > { %v4493_v17 = vpop.eup %2860  ;;  %v1224_v32 = vmul.f32 %v4477_v14, %v4424_v50  ;;  %v1402_v53 = vadd.f32 %v5512_v34, %v1381_v46  ;;  %v2216_v46 = vmul.f32 -1.442695, %v1008_v39  ;;  %v1212_v34 = vadd.f32 %v4418_v19, %v1211_v11  ;;  %vm4581_vm2 = vmor %vm1473_vm8, %vm1474_vm13 }
 0x306   : > { %v4510_v52 = vpop.eup %2862  ;;  %v4528_v16 = vmul.f32 %v4493_v17, %v4422_v29  ;;  %v1393_v56 = vadd.f32 %v5520_v31, %v1359_v20  ;;  %v1472_v39 = vadd.f32 %v4426_v59, %v1471_v0  ;;  %v2224_v11 = vmul.f32 -1.442695, %v1028_v57  ;;  %v1010_v0 = vpop.f32.mrf.mxu0 }
 0x307   : > { %v2865_v24 = vpop.eup %2864  ;;  %v1225_v51 = vsub.f32 1.0, %v1224_v32  ;;  %v1484_v18 = vmul.f32 %v4510_v52, %v4436_v48  ;;  %2870 = vtanh.f32 %v1402_v53  ;;  %v1622_v32 = vadd.f32 %v4439_v6, %v1621_v15  ;;  %v4557_v53 = vld [vmem:[%s4350_s12 + $0x38] sm:$0xff]  }
 0x308   : > { %v2867_v3 = vpop.eup %2866  ;;  %2872 = vpow2.f32 %v2216_v46  ;;  %v2239_v43 = vmul.f32 -1.442695, %v1393_v56  ;;  %v1630_v20 = vor.u32 1.1754944e-38, %v1629_v5  ;;  %v4562_v56 = vsel %vm4471_vm3, %v4432_v33, %v1611_v10 }
 0x309   : > { %v2869_v62 = vpop.eup %2868  ;;  %v4540_v40 = vadd.f32 1.0, %v2867_v3  ;;  %v4553_v3 = vadd.f32 1.0, %v2865_v24  ;;  %v1226_v49 = vmul.f32 %v4477_v14, %v1225_v51  ;;  %vm1228_vm0 = vweird.f32 %v4424_v50  ;;  %v1361_v45 = vpop.f32.mrf.mxu1  ;;  %v2453_v24 = vld [vmem:[%s4350_s12 + $0x18] sm:$0xff]  }
 0x30a   : > { %v4573_v5 = vadd.f32 1.0, %v2869_v62  ;;  %v1235_v33 = vor.u32 1.1754944e-38, %v1234_v37  ;;  %v1216_v62 = vsel %vm4548_vm14, %v4418_v19, %v1212_v34  ;;  %v1485_v9 = vsub.f32 1.0, %v1484_v18  ;;  %v5531_v34 = vld [vmem:[#allocation8_spill] sm:$0xff] }
 0x30b   : > { %2874 = vrcp.f32 %v4540_v40  ;;  %vm4588_vm3 = vcmp.eq.f32.partialorder %v1232_v30, 8.507059e+37  ;;  %v1476_v37 = vsel %vm4581_vm2, %v4426_v59, %v1472_v39  ;;  %v2435_v15 = vunpack.c.l.bf16 %v4557_v53  ;;  %v1384_v30 = vpop.f32.mrf.mxu3 }
 0x30c   : > { %2876 = vpow2.f32 %v2239_v43  ;;  %v1626_v51 = vsel %vm4568_vm15, %v4439_v6, %v1622_v32  ;;  %v5530_v19 = vand.u32 2147483648, %v4379_v63  ;;  %v1011_v31 = vadd.f32 %v1010_v0, %v5531_v34 }
 0x30d   : > { %2878 = vpow2.f32 %v2224_v11  ;;  %v2871_v46 = vpop.eup %2870  ;;  %v1227_v43 = vadd.f32 %v4477_v14, %v1226_v49  ;;  %vm1229_vm4 = vweird.f32 %v4477_v14  ;;  %v4611_v6 = vsel %vm4513_vm7, %v4487_v44, %v1216_v62 }
 0x30e   : > { %2880 = vrcp.f32 %v4553_v3  ;;  %v1480_v18 = vor.u32 1.1754944e-38, %v5530_v19  ;;  %v2873_v38 = vpop.eup %2872  ;;  %v2217_v39 = vmul.f32 -1.442695, %v1011_v31  ;;  %v2416_v11 = vunpack.c.h.bf16 %v4403_v7  ;;  %vm4625_vm5 = vmor %vm1228_vm0, %vm1229_vm4 }
 0x30f   : > { %2882 = vrcp.f32 %v4573_v5  ;;  %v4618_v57 = vsel %vm4522_vm11, %v1630_v20, %v1626_v51  ;;  %v1403_v0 = vadd.f32 %v2435_v15, %v1384_v30  ;;  %v1486_v54 = vmul.f32 %v4510_v52, %v1485_v9 }
 0x310   : > { %v1481_v63 = vsel %vm4531_vm12, %v1480_v18, %v1476_v37  ;;  %v4629_v7 = vadd.f32 1.0, %v2873_v38  ;;  %2884 = vpow2.f32 %v2217_v39  ;;  %v1231_v21 = vsel %vm4625_vm5, %v4477_v14, %v1227_v43 }
 0x311   : > { %v4606_v59 = vpop.eup %2874  ;;  %v1394_v9 = vadd.f32 %v2416_v11, %v1361_v45  ;;  %vm1243_vm6 = vweird.f32 %v4540_v40  ;;  %v1247_v50 = vand.u32 2147483647, %v4540_v40  ;;  %v4642_v15 = vmul.f32 %v2871_v46, %v1481_v63 }
 0x312   : > { %v2877_v32 = vpop.eup %2876  ;;  %v1239_v49 = vmul.f32 %v4606_v59, %v4540_v40  ;;  %v1487_v19 = vadd.f32 %v4510_v52, %v1486_v54  ;;  %vm1489_vm8 = vweird.f32 %v4510_v52  ;;  %v1494_v14 = vand.u32 2147483648, %v4436_v48  ;;  %v1030_v54 = vpop.f32.mrf.mxu2 }
 0x313   : > { %v2879_v44 = vpop.eup %2878  ;;  %v4631_v61 = vadd.f32 1.0, %v2877_v32  ;;  %v4652_v18 = vsel %vm4588_vm3, %v1235_v33, %v1231_v21  ;;  %v1249_v46 = vand.u32 2147483648, %v4540_v40  ;;  %vm1488_vm9 = vweird.f32 %v4436_v48 }
 0x314   : > { %v1240_v20 = vsub.f32 1.0, %v1239_v49  ;;  %v4636_v62 = vadd.f32 1.0, %v2879_v44  ;;  %v4638_v37 = vpop.eup %2880  ;;  %v1492_v34 = vand.u32 2147483647, %v4436_v48  ;;  %v2240_v31 = vmul.f32 -1.442695, %v1394_v9  ;;  %vm4675_vm11 = vmor %vm1488_vm9, %vm1489_vm8 }
 0x315   : > { %2886 = vrcp.f32 %v4631_v61  ;;  %v4645_v51 = vpop.eup %2882  ;;  %v4662_v43 = vmul.f32 %v4638_v37, %v4553_v3  ;;  %vm1244_vm7 = vweird.f32 %v4606_v59  ;;  %vm4669_vm10 = vcmp.eq.f32.partialorder %v1247_v50, 8.507059e+37 }
 0x316   : > { %2888 = vtanh.f32 %v1403_v0  ;;  %v1241_v30 = vmul.f32 %v4606_v59, %v1240_v20  ;;  %v2885_v38 = vpop.eup %2884  ;;  %v4666_v33 = vmul.f32 %v4645_v51, %v4573_v5  ;;  %v1491_v63 = vsel %vm4675_vm11, %v4510_v52, %v1487_v19  ;;  %vm4689_vm12 = vmor %vm1243_vm6, %vm1244_vm7 }
 0x317   : > { %2890 = vrcp.f32 %v4629_v7  ;;  %v1495_v39 = vor.u32 1.1754944e-38, %v1494_v14  ;;  %v4682_v11 = vadd.f32 1.0, %v2885_v38  ;;  %v1522_v49 = vand.u32 2147483647, %v4631_v61 }
 0x318   : > { %2892 = vrcp.f32 %v4636_v62  ;;  %v1242_v32 = vadd.f32 %v4606_v59, %v1241_v30  ;;  %v1524_v0 = vand.u32 2147483648, %v4631_v61  ;;  %v1250_v52 = vor.u32 1.1754944e-38, %v1249_v46  ;;  %v5540_v30 = vld [vmem:[#allocation62_spill] sm:$0xff] }
 0x319   : > { %2894 = vpow2.f32 %v2240_v31  ;;  %vm1493_vm13 = vcmp.eq.f32.partialorder %v1492_v34, 8.507059e+37  ;;  %v1500_v50 = vsub.f32 1.0, %v4666_v33  ;;  %v1031_v31 = vadd.f32 %v1030_v54, %v5540_v30 }
 0x31a   : > { %2896 = vrcp.f32 %v4682_v11  ;;  %v1496_v19 = vsel %vm1493_vm13, %v1495_v39, %v1491_v63  ;;  %v5541_v38 = vsub.f32 1.0, %v4465_v35  ;;  %v5542_v34 = vperm.slane %v4390_v12, 0 }
 0x31b   : > { %v2887_v45 = vpop.eup %2886  ;;  %v1246_v33 = vsel %vm4689_vm12, %v4606_v59, %v1242_v32  ;;  %vm1518_vm15 = vweird.f32 %v4631_v61  ;;  %vm4715_vm0 = vcmp.eq.f32.partialorder %v1522_v49, 8.507059e+37  ;;  %v1525_v39 = vor.u32 1.1754944e-38, %v1524_v0 }
 0x31c   : > { %v2889_v44 = vpop.eup %2888  ;;  %v1514_v21 = vmul.f32 %v2887_v45, %v4631_v61  ;;  %v1091_v46 = vmul.f32 %v4430_v26, %v5541_v38  ;;  %vm4707_vm14 = vcmp.eq.s32.totalorder %v5542_v34, 1  ;;  %vm1519_vm2 = vweird.f32 %v2887_v45 }
 0x31d   : > { %v4695_v20 = vpop.eup %2890  ;;  %vm1093_vm3 = vweird.f32 %v4383_v41  ;;  %v4732_v49 = vsel %vm4669_vm10, %v1250_v52, %v1246_v33  ;;  %vm1094_vm4 = vweird.f32 %v4430_v26  ;;  %vm1520_vm5 = vmor %vm1518_vm15, %vm1519_vm2  ;;  %v1097_v30 = vand.u32 2147483647, %v4383_v41 }
 0x31e   : > { %v4699_v14 = vpop.eup %2892  ;;  %v1515_v40 = vsub.f32 1.0, %v1514_v21  ;;  %v4719_v21 = vmul.f32 %v2889_v44, %v1496_v19  ;;  %v4723_v12 = vmul.f32 %v4695_v20, %v4629_v7  ;;  %v1092_v44 = vadd.f32 %v4430_v26, %v1091_v46  ;;  %v1012_v46 = vpop.f32.mrf.mxu0  ;;  %vm4748_vm6 = vmor %vm1093_vm3, %vm1094_vm4 }
 0x31f   : > { %v2895_v35 = vpop.eup %2894  ;;  %v1254_v28 = vmul.f32 %v4699_v14, %v4636_v62  ;;  %v1099_v10 = vand.u32 2147483648, %v4383_v41  ;;  %v1157_v52 = vand.u32 2147483647, %v4682_v11  ;;  %vm1153_vm9 = vweird.f32 %v4682_v11 }
 0x320   : > { %v1516_v54 = vmul.f32 %v2887_v45, %v1515_v40  ;;  %v4727_v59 = vadd.f32 1.0, %v2895_v35  ;;  %v2897_v32 = vpop.eup %2896  ;;  %v1159_v40 = vand.u32 2147483648, %v4682_v11  ;;  %v1096_v41 = vsel %vm4748_vm6, %v4430_v26, %v1092_v44 }
 0x321   : > { %v1149_v19 = vmul.f32 %v2897_v32, %v4682_v11  ;;  %v1255_v61 = vsub.f32 1.0, %v1254_v28  ;;  %vm1154_vm7 = vweird.f32 %v2897_v32  ;;  %vm4765_vm10 = vcmp.eq.f32.partialorder %v1097_v30, 8.507059e+37 }
 0x322   : > { %v1517_v0 = vadd.f32 %v2887_v45, %v1516_v54  ;;  %2898 = vrcp.f32 %v4727_v59  ;;  %v2436_v54 = vunpack.c.h.bf16 %v4557_v53  ;;  %v1160_v53 = vor.u32 1.1754944e-38, %v1159_v40  ;;  %vm1155_vm12 = vmor %vm1153_vm9, %vm1154_vm7 }
 0x323   : > { %2900 = vtanh.f32 %v1031_v31  ;;  %v1150_v33 = vsub.f32 1.0, %v1149_v19  ;;  %v1364_v19 = vpop.f32.mrf.mxu1  ;;  %v5554_v31 = vld [vmem:[#allocation27_spill] sm:$0xff]  ;;  %v4776_v26 = vmul.f32 %v4699_v14, %v1255_v61  ;;  %vm1158_vm11 = vcmp.eq.f32.partialorder %v1157_v52, 8.507059e+37 }
 0x324   : > { %v1521_v38 = vsel %vm1520_vm5, %v2887_v45, %v1517_v0  ;;  %v5549_v45 = vperm.slane %v4387_v58, 0  ;;  %v1013_v9 = vadd.f32 %v1012_v46, %v5554_v31  ;;  %v1539_v52 = vand.u32 2147483648, %v4727_v59  ;;  %v1032_v58 = vpop.f32.mrf.mxu2 }
 0x325   : > { %v1526_v34 = vsel %vm4715_vm0, %v1525_v39, %v1521_v38  ;;  %v1386_v39 = vpop.f32.mrf.mxu3  ;;  %v1151_v28 = vmul.f32 %v2897_v32, %v1150_v33  ;;  %vm1503_vm13 = vweird.f32 %v4573_v5  ;;  %vm1504_vm15 = vweird.f32 %v4645_v51 }
 0x326   : > { %vm4755_vm8 = vcmp.eq.s32.totalorder %v5549_v45, 1  ;;  %v1637_v63 = vmul.f32 %v3180_v47, %v1526_v34  ;;  %v1100_v45 = vor.u32 1.1754944e-38, %v1099_v10  ;;  %v1501_v34 = vmul.f32 %v4645_v51, %v1500_v50  ;;  %vm4822_vm6 = vmor %vm1503_vm13, %vm1504_vm15 }
 0x327   : > { %v1152_v44 = vadd.f32 %v2897_v32, %v1151_v28  ;;  %v1404_v40 = vadd.f32 %v2436_v54, %v1386_v39  ;;  %v1537_v10 = vand.u32 2147483647, %v4727_v59  ;;  %v2218_v33 = vmul.f32 -1.442695, %v1013_v9  ;;  %v1015_v9 = vpop.f32.mrf.mxu0 }
 0x328   : > { %v4770_v38 = vadd.f32 %v4505_v36, %v1637_v63  ;;  %v2899_v35 = vpop.eup %2898  ;;  %v1101_v46 = vsel %vm4765_vm10, %v1100_v45, %v1096_v41  ;;  %v2419_v54 = vunpack.c.l.bf16 %v2453_v24  ;;  %v1502_v63 = vadd.f32 %v4645_v51, %v1501_v34 }
 0x329   : > { %v2901_v30 = vpop.eup %2900  ;;  %v1529_v50 = vmul.f32 %v2899_v35, %v4727_v59  ;;  %v1156_v61 = vsel %vm1155_vm12, %v2897_v32, %v1152_v44  ;;  %2902 = vpow2.f32 %v2218_v33  ;;  %vm1533_vm0 = vweird.f32 %v4727_v59 }
 0x32a   : > { %v4782_v47 = vsel %vm4707_vm14, %v4770_v38, %v3180_v47   ;;  %v1276_v39 = vmul.f32 %v2901_v30, %v1101_v46  ;;  %v1395_v28 = vadd.f32 %v2419_v54, %v1364_v19  ;;  %vm1534_vm2 = vweird.f32 %v2899_v35  ;;  %v5559_v46 = vld [vmem:[#allocation12_spill] sm:$0xff] }
 0x32b   : > { %v5555_v36 = vmov %v4782_v47  ;;  %v1530_v31 = vsub.f32 1.0, %v1529_v50  ;;  %v1161_v47 = vsel %vm1158_vm11, %v1160_v53, %v1156_v61  ;;  %vm4797_vm3 = vcmp.eq.f32.partialorder %v1537_v10, 8.507059e+37  ;;  %vm1535_vm4 = vmor %vm1533_vm0, %vm1534_vm2 }
 0x32c   : > { %v1272_v11 = vmul.f32 %v3148_v22, %v1161_v47  ;;  %v1540_v53 = vor.u32 1.1754944e-38, %v1539_v52  ;;  %v2241_v34 = vmul.f32 -1.442695, %v1395_v28  ;;  %v5558_v44 = vsub.f32 1.0, %v4528_v16  ;;  %v5561_v52 = vld [vmem:[#allocation26_spill] sm:$0xff]  ;;  %v1366_v16 = vpop.f32.mrf.mxu1 }
 0x32d   : > { %v1531_v41 = vmul.f32 %v2899_v35, %v1530_v31  ;;  %v1507_v19 = vand.u32 2147483647, %v4573_v5  ;;  %2904 = vtanh.f32 %v1404_v40  ;;  %v1033_v61 = vadd.f32 %v1032_v58, %v5559_v46 }
 0x32e   : > { %v1280_v45 = vadd.f32 %v1276_v39, %v1272_v11  ;;  %v1106_v50 = vmul.f32 %v4493_v17, %v5558_v44  ;;  %v1509_v10 = vand.u32 2147483648, %v4573_v5  ;;  %v1016_v33 = vadd.f32 %v1015_v9, %v5561_v52 }
 0x32f   : > { %v1532_v30 = vadd.f32 %v2899_v35, %v1531_v41  ;;  %v2420_v31 = vunpack.c.h.bf16 %v2453_v24  ;;  %v2903_v47 = vpop.eup %2902  ;;  %vm1109_vm5 = vweird.f32 %v4493_v17  ;;  %v1506_v58 = vsel %vm4822_vm6, %v4645_v51, %v1502_v63  ;;  %v5576_v63 = vld [vmem:[#allocation9_spill] sm:$0xff] }
 0x330   : > { %2906 = vtanh.f32 %v1280_v45  ;;  %v4809_v22 = vsel %vm4755_vm8, %v1280_v45, %v3148_v22   ;;  %v1107_v11 = vadd.f32 %v4493_v17, %v1106_v50  ;;  %v2219_v39 = vmul.f32 -1.442695, %v1016_v33 }
 0x331   : > { %v5560_v59 = vmov %v4809_v22  ;;  %v1536_v54 = vsel %vm1535_vm4, %v2899_v35, %v1532_v30  ;;  %2908 = vpow2.f32 %v2241_v34  ;;  %v4826_v24 = vadd.f32 1.0, %v2903_v47 }
 0x332   : > { %v1541_v40 = vsel %vm4797_vm3, %v1540_v53, %v1536_v54  ;;  %2910 = vtanh.f32 %v1033_v61  ;;  %v1396_v35 = vadd.f32 %v2420_v31, %v1366_v16  ;;  %vm4831_vm9 = vcmp.eq.f32.partialorder %v1507_v19, 8.507059e+37  ;;  %v5571_v16 = vld [vmem:[#allocation65_spill] sm:$0xff] }
 0x333   : > { %v1638_v28 = vmul.f32 %v3176_v60, %v1541_v40  ;;  %v1114_v32 = vand.u32 2147483648, %v4422_v29  ;;  %2912 = vpow2.f32 %v2219_v39  ;;  %v4836_v5 = vpop.eup %2904  ;;  %vm1108_vm7 = vweird.f32 %v4422_v29 }
 0x334   : > { %2914 = vrcp.f32 %v4826_v24  ;;  %v1112_v53 = vand.u32 2147483647, %v4422_v29  ;;  %v1510_v51 = vor.u32 1.1754944e-38, %v1509_v10  ;;  %vm4847_vm10 = vmor %vm1108_vm7, %vm1109_vm5  ;;  %v2242_v34 = vmul.f32 -1.442695, %v1396_v35 }
 0x335   : > { %v4839_v9 = vadd.f32 %v4642_v15, %v1638_v28  ;;  %2916 = vtanh.f32 %v4770_v38  ;;  %v1111_v15 = vsel %vm4847_vm10, %v4493_v17, %v1107_v11  ;;  %v1035_v38 = vpop.f32.mrf.mxu2  ;;  %v5569_v30 = vsub.f32 1.0, %v4662_v43  ;;  %v4891_v28 = vld [vmem:[%s4350_s12 + $0x20] sm:$0xff]  }
 0x336   : > { %v2907_v45 = vpop.eup %2906  ;;  %v4866_v46 = vsel %vm4831_vm9, %v1510_v51, %v1506_v58  ;;  %v1115_v10 = vor.u32 1.1754944e-38, %v1114_v32  ;;  %2918 = vpow2.f32 %v2242_v34  ;;  %v1174_v17 = vand.u32 2147483648, %v4826_v24 }
 0x337   : > { %v2909_v44 = vpop.eup %2908  ;;  %v4855_v60 = vsel %vm4707_vm14, %v4839_v9, %v3176_v60   ;;  %v1288_v29 = vmul.f32 %v2907_v45, %v4611_v6  ;;  %v1121_v19 = vmul.f32 %v4638_v37, %v5569_v30  ;;  %vm1113_vm11 = vcmp.eq.f32.partialorder %v1112_v53, 8.507059e+37 }
 0x338   : > { %v5568_v50 = vmov %v4855_v60  ;;  %v4868_v61 = vadd.f32 1.0, %v2909_v44  ;;  %v2911_v60 = vpop.eup %2910  ;;  %v1116_v43 = vsel %vm1113_vm11, %v1115_v10, %v1111_v15  ;;  %v1172_v33 = vand.u32 2147483647, %v4826_v24 }
 0x339   : > { %v4873_v2 = vsel %vm4755_vm8, %v1288_v29, %v3164_v2   ;;  %v2913_v6 = vpop.eup %2912  ;;  %v1036_v54 = vadd.f32 %v1035_v38, %v5571_v16  ;;  %v4882_v40 = vadd.f32 %v4638_v37, %v1121_v19  ;;  %vm1123_vm12 = vweird.f32 %v4553_v3 }
 0x33a   : > { %v5570_v52 = vmov %v4873_v2  ;;  %2920 = vrcp.f32 %v4868_v61  ;;  %v2915_v31 = vpop.eup %2914  ;;  %v4879_v47 = vadd.f32 1.0, %v2913_v6  ;;  %vm1124_vm13 = vweird.f32 %v4638_v37  ;;  %v1017_v2 = vpop.f32.mrf.mxu0 }
 0x33b   : > { %v4886_v11 = vpop.eup %2916  ;;  %v1164_v39 = vmul.f32 %v2915_v31, %v4826_v24  ;;  %vm1168_vm15 = vweird.f32 %v4826_v24  ;;  %v1175_v22 = vor.u32 1.1754944e-38, %v1174_v17  ;;  %v1277_v35 = vmul.f32 %v2911_v60, %v1116_v43  ;;  %vm4902_vm2 = vmor %vm1123_vm12, %vm1124_vm13  ;;  %v1369_v60 = vpop.f32.mrf.mxu1 }
 0x33c   : > { %2922 = vrcp.f32 %v4879_v47  ;;  %v1127_v58 = vand.u32 2147483647, %v4553_v3  ;;  %v2919_v41 = vpop.eup %2918  ;;  %v1552_v53 = vand.u32 2147483647, %v4868_v61  ;;  %vm4896_vm0 = vcmp.eq.f32.partialorder %v1172_v33, 8.507059e+37 }
 0x33d   : > { %v1165_v32 = vsub.f32 1.0, %v1164_v39  ;;  %v1018_v34 = vadd.f32 %v1017_v2, %v5576_v63  ;;  %v4907_v44 = vadd.f32 1.0, %v2919_v41  ;;  %v1126_v29 = vsel %vm4902_vm2, %v4638_v37, %v4882_v40 }
 0x33e   : > { %v2423_v15 = vunpack.c.l.bf16 %v4891_v28  ;;  %vm1169_vm3 = vweird.f32 %v2915_v31  ;;  %v1554_v19 = vand.u32 2147483648, %v4868_v61  ;;  %vm1548_vm4 = vweird.f32 %v4868_v61 }
 0x33f   : > { %v1166_v30 = vmul.f32 %v2915_v31, %v1165_v32  ;;  %v2220_v10 = vmul.f32 -1.442695, %v1018_v34  ;;  %2924 = vrcp.f32 %v4907_v44  ;;  %vm4918_vm5 = vcmp.eq.f32.partialorder %v1127_v58, 8.507059e+37  ;;  %vm1170_vm9 = vmor %vm1168_vm15, %vm1169_vm3 }
 0x340   : > { %v2921_v38 = vpop.eup %2920  ;;  %vm4922_vm6 = vcmp.eq.f32.partialorder %v1552_v53, 8.507059e+37  ;;  %v1129_v33 = vand.u32 2147483648, %v4553_v3  ;;  %2926 = vtanh.f32 %v1036_v54  ;;  %v1189_v2 = vand.u32 2147483648, %v4879_v47 }
 0x341   : > { %v1544_v17 = vmul.f32 %v2921_v38, %v4868_v61  ;;  %v1167_v43 = vadd.f32 %v2915_v31, %v1166_v30  ;;  %2928 = vpow2.f32 %v2220_v10  ;;  %v1397_v39 = vadd.f32 %v2423_v15, %v1369_v60 }
 0x342   : > { %v2923_v16 = vpop.eup %2922  ;;  %v1555_v58 = vor.u32 1.1754944e-38, %v1554_v19  ;;  %v1187_v53 = vand.u32 2147483647, %v4879_v47  ;;  %vm1549_vm7 = vweird.f32 %v2921_v38  ;;  %v1130_v34 = vor.u32 1.1754944e-38, %v1129_v33 }
 0x343   : > { %v1545_v40 = vsub.f32 1.0, %v1544_v17  ;;  %v1171_v41 = vsel %vm1170_vm9, %v2915_v31, %v1167_v43  ;;  %v1179_v32 = vmul.f32 %v2923_v16, %v4879_v47  ;;  %v2243_v54 = vmul.f32 -1.442695, %v1397_v39  ;;  %vm1550_vm11 = vmor %vm1548_vm4, %vm1549_vm7 }
 0x344   : > { %v1176_v3 = vsel %vm4896_vm0, %v1175_v22, %v1171_v41  ;;  %vm1183_vm10 = vweird.f32 %v4879_v47  ;;  %v1190_v15 = vor.u32 1.1754944e-38, %v1189_v2  ;;  %v1131_v22 = vsel %vm4918_vm5, %v1130_v34, %v1126_v29  ;;  %v1037_v47 = vpop.f32.mrf.mxu2 }
 0x345   : > { %v1546_v51 = vmul.f32 %v2921_v38, %v1545_v40  ;;  %v1273_v24 = vmul.f32 %v3144_v8, %v1176_v3  ;;  %v1180_v63 = vsub.f32 1.0, %v1179_v32  ;;  %v2925_v30 = vpop.eup %2924  ;;  %2930 = vpow2.f32 %v2243_v54 }
 0x346   : > { %v2927_v31 = vpop.eup %2926  ;;  %v1559_v45 = vmul.f32 %v2925_v30, %v4907_v44  ;;  %vm1184_vm12 = vweird.f32 %v2923_v16  ;;  %vm4941_vm13 = vcmp.eq.f32.partialorder %v1187_v53, 8.507059e+37  ;;  %v1569_v29 = vand.u32 2147483648, %v4907_v44 }
 0x347   : > { %v1547_v17 = vadd.f32 %v2921_v38, %v1546_v51  ;;  %v1281_v19 = vadd.f32 %v1277_v35, %v1273_v24  ;;  %v1181_v10 = vmul.f32 %v2923_v16, %v1180_v63  ;;  %v2929_v60 = vpop.eup %2928  ;;  %vm1185_vm15 = vmor %vm1183_vm10, %vm1184_vm12  ;;  %vm1563_vm0 = vweird.f32 %v4907_v44 }
 0x348   : > { %v1560_v35 = vsub.f32 1.0, %v1559_v45  ;;  %v4954_v2 = vadd.f32 1.0, %v2929_v60  ;;  %vm1564_vm2 = vweird.f32 %v2925_v30  ;;  %v1567_v37 = vand.u32 2147483647, %v4907_v44  ;;  %v1371_v60 = vpop.f32.mrf.mxu1 }
 0x349   : > { %v1551_v43 = vsel %vm1550_vm11, %v2921_v38, %v1547_v17  ;;  %2932 = vtanh.f32 %v1281_v19  ;;  %v4950_v8 = vsel %vm4755_vm8, %v1281_v19, %v3144_v8   ;;  %v1182_v38 = vadd.f32 %v2923_v16, %v1181_v10  ;;  %vm1565_vm3 = vmor %vm1563_vm0, %vm1564_vm2  ;;  %v5586_v19 = vld [vmem:[#allocation64_spill] sm:$0xff] }
 0x34a   : > { %v1556_v40 = vsel %vm4922_vm6, %v1555_v58, %v1551_v43  ;;  %v5583_v61 = vmov %v4950_v8  ;;  %v1561_v39 = vmul.f32 %v2925_v30, %v1560_v35  ;;  %v1278_v32 = vmul.f32 %v2927_v31, %v1131_v22 }
 0x34b   : > { %v1639_v6 = vmul.f32 %v3172_v42, %v1556_v40  ;;  %v2931_v58 = vpop.eup %2930  ;;  %v1186_v41 = vsel %vm1185_vm15, %v2923_v16, %v1182_v38  ;;  %2934 = vrcp.f32 %v4954_v2  ;;  %v5584_v54 = vsub.f32 1.0, %v4723_v12 }
 0x34c   : > { %v1562_v53 = vadd.f32 %v2925_v30, %v1561_v39  ;;  %v1191_v51 = vsel %vm4941_vm13, %v1190_v15, %v1186_v41  ;;  %v4964_v3 = vadd.f32 1.0, %v2931_v58  ;;  %vm1568_vm4 = vcmp.eq.f32.partialorder %v1567_v37, 8.507059e+37 }
 0x34d   : > { %v1647_v8 = vadd.f32 %v4719_v21, %v1639_v6  ;;  %v1136_v24 = vmul.f32 %v4695_v20, %v5584_v54  ;;  %v1570_v21 = vor.u32 1.1754944e-38, %v1569_v29  ;;  %v1274_v63 = vmul.f32 %v3140_v4, %v1191_v51 }
 0x34e   : > { %v1566_v17 = vsel %vm1565_vm3, %v2925_v30, %v1562_v53  ;;  %v1038_v10 = vadd.f32 %v1037_v47, %v5586_v19  ;;  %vm1139_vm5 = vweird.f32 %v4695_v20  ;;  %vm1138_vm6 = vweird.f32 %v4629_v7 }
 0x34f   : > { %2936 = vtanh.f32 %v1647_v8  ;;  %v4972_v42 = vsel %vm4707_vm14, %v1647_v8, %v3172_v42   ;;  %v2933_v34 = vpop.eup %2932  ;;  %v1571_v15 = vsel %vm1568_vm4, %v1570_v21, %v1566_v17  ;;  %v1282_v31 = vadd.f32 %v1278_v32, %v1274_v63  ;;  %vm5009_vm9 = vmor %vm1138_vm6, %vm1139_vm5 }
 0x350   : > { %v5585_v16 = vmov %v4972_v42  ;;  %2938 = vrcp.f32 %v4964_v3  ;;  %v1289_v12 = vmul.f32 %v2933_v34, %v4652_v18  ;;  %v1644_v42 = vmul.f32 %v4836_v5, %v4866_v46 }
 0x351   : > { %v1640_v44 = vmul.f32 %v3168_v13, %v1571_v15  ;;  %v1137_v45 = vadd.f32 %v4695_v20, %v1136_v24  ;;  %v2935_v22 = vpop.eup %2934  ;;  %2940 = vtanh.f32 %v1282_v31  ;;  %v4993_v4 = vsel %vm4755_vm8, %v1282_v31, %v3140_v4  }
 0x352   : > { %v4988_v55 = vsel %vm4755_vm8, %v1289_v12, %v3160_v55   ;;  %v5588_v43 = vmov %v4993_v4  ;;  %v1142_v18 = vand.u32 2147483647, %v4629_v7  ;;  %v1194_v46 = vmul.f32 %v2935_v22, %v4954_v2 }
 0x353   : > { %v5587_v30 = vmov %v4988_v55  ;;  %v1648_v5 = vadd.f32 %v1644_v42, %v1640_v44  ;;  %v1204_v40 = vand.u32 2147483648, %v4954_v2  ;;  %v1144_v35 = vand.u32 2147483648, %v4629_v7 }
 0x354   : > { %2942 = vtanh.f32 %v1038_v10  ;;  %v2424_v55 = vunpack.c.h.bf16 %v4891_v28  ;;  %v1195_v4 = vsub.f32 1.0, %v1194_v46  ;;  %v1141_v28 = vsel %vm5009_vm9, %v4695_v20, %v1137_v45 }
 0x355   : > { %v2937_v33 = vpop.eup %2936  ;;  %2944 = vtanh.f32 %v1648_v5  ;;  %v5005_v13 = vsel %vm4707_vm14, %v1648_v5, %v3168_v13   ;;  %vm5017_vm7 = vcmp.eq.f32.partialorder %v1142_v18, 8.507059e+37  ;;  %vm1199_vm10 = vweird.f32 %v2935_v22 }
 0x356   : > { %v2939_v6 = vpop.eup %2938  ;;  %v1655_v29 = vmul.f32 %v2937_v33, %v4562_v56  ;;  %v5589_v38 = vmov %v5005_v13  ;;  %v1398_v37 = vadd.f32 %v2424_v55, %v1371_v60  ;;  %v1196_v13 = vmul.f32 %v2935_v22, %v1195_v4  ;;  %v5597_v33 = vld [vmem:[#allocation68_spill] sm:$0xff]  ;;  %v5598_v4 = vld [vmem:[#allocation66_spill] sm:$0xff] }
 0x357   : > { %v1574_v7 = vmul.f32 %v2939_v6, %v4964_v3  ;;  %v1202_v8 = vand.u32 2147483647, %v4954_v2  ;;  %v2941_v41 = vpop.eup %2940  ;;  %vm1198_vm11 = vweird.f32 %v4954_v2  ;;  %v1145_v53 = vor.u32 1.1754944e-38, %v1144_v35 }
 0x358   : > { %v5024_v23 = vsel %vm4707_vm14, %v1655_v29, %v3188_v23   ;;  %v2244_v20 = vmul.f32 -1.442695, %v1398_v37  ;;  %v1290_v51 = vmul.f32 %v2941_v41, %v4732_v49  ;;  %v1205_v47 = vor.u32 1.1754944e-38, %v1204_v40  ;;  %vm1200_vm12 = vmor %vm1198_vm11, %vm1199_vm10 }
 0x359   : > { %v5594_v58 = vmov %v5024_v23  ;;  %v1575_v32 = vsub.f32 1.0, %v1574_v7  ;;  %v1584_v54 = vand.u32 2147483648, %v4964_v3  ;;  %v1197_v24 = vadd.f32 %v2935_v22, %v1196_v13 }
 0x35a   : > { %v2943_v21 = vpop.eup %2942  ;;  %vm1579_vm13 = vweird.f32 %v2939_v6  ;;  %v1582_v23 = vand.u32 2147483647, %v4964_v3  ;;  %2946 = vpow2.f32 %v2244_v20  ;;  %v5034_v1 = vsel %vm4755_vm8, %v1290_v51, %v3156_v1  }
 0x35b   : > { %v1576_v63 = vmul.f32 %v2939_v6, %v1575_v32  ;;  %v2945_v34 = vpop.eup %2944  ;;  %v5595_v17 = vmov %v5034_v1  ;;  %vm1578_vm15 = vweird.f32 %v4964_v3  ;;  %v1201_v49 = vsel %vm1200_vm12, %v2935_v22, %v1197_v24 }
 0x35c   : > { %vm1203_vm0 = vcmp.eq.f32.partialorder %v1202_v8, 8.507059e+37  ;;  %v1656_v2 = vmul.f32 %v2945_v34, %v4618_v57  ;;  %v1146_v15 = vsel %vm5017_vm7, %v1145_v53, %v1141_v28  ;;  %vm1580_vm2 = vmor %vm1578_vm15, %vm1579_vm13  ;;  %v1585_v19 = vor.u32 1.1754944e-38, %v1584_v54  ;;  %v5599_v53 = vld [vmem:[#allocation67_spill] sm:$0xff] }
 0x35d   : > { %v1577_v12 = vadd.f32 %v2939_v6, %v1576_v63  ;;  %v1206_v31 = vsel %vm1203_vm0, %v1205_v47, %v1201_v49  ;;  %v1279_v42 = vmul.f32 %v2943_v21, %v1146_v15  ;;  %vm1583_vm3 = vcmp.eq.f32.partialorder %v1582_v23, 8.507059e+37 }
 0x35e   : > { %v1275_v10 = vmul.f32 %v3136_v27, %v1206_v31  ;;  %v5044_v25 = vsel %vm4707_vm14, %v1656_v2, %v3184_v25   ;;  %v1257_v22 = vadd.f32 %v4699_v14, %v4776_v26  ;;  %vm1258_vm4 = vweird.f32 %v4636_v62 }
 0x35f   : > { %v5596_v44 = vmov %v5044_v25  ;;  %v1581_v1 = vsel %vm1580_vm2, %v2939_v6, %v1577_v12  ;;  %vm1259_vm5 = vweird.f32 %v4699_v14  ;;  %v1264_v5 = vand.u32 2147483648, %v4636_v62 }
 0x360   : > { %v1586_v3 = vsel %vm1583_vm3, %v1585_v19, %v1581_v1  ;;  %v1283_v45 = vadd.f32 %v1279_v42, %v1275_v10  ;;  %v2947_v57 = vpop.eup %2946  ;;  %v1262_v60 = vand.u32 2147483647, %v4636_v62  ;;  %vm1260_vm6 = vmor %vm1258_vm4, %vm1259_vm5  ;;  %v5606_v1 = vmov %v5595_v17 }
 0x361   : > { %v1653_v18 = vmul.f32 %v4886_v11, %v1586_v3  ;;  %v1450_v25 = vadd.f32 1.0, %v2947_v57  ;;  %v1261_v40 = vsel %vm1260_vm6, %v4699_v14, %v1257_v22  ;;  %v1265_v35 = vor.u32 1.1754944e-38, %v1264_v5 }
 0x362   : > { %2948 = vtanh.f32 %v1283_v45  ;;  %v1304_v46 = vsel %vm4755_vm8, %v1283_v45, %v3136_v27   ;;  %vm1263_vm9 = vcmp.eq.f32.partialorder %v1262_v60, 8.507059e+37  ;;  %v5604_v22 = vmov %v5560_v59 }
 0x363   : > { %v1662_v26 = vsel %vm4707_vm14, %v1653_v18, %v5597_v33   ;;  %2950 = vrcp.f32 %v1450_v25  ;;  %v1266_v55 = vsel %vm1263_vm9, %v1265_v35, %v1261_v40  ;;  %v1599_v7 = vand.u32 2147483648, %v1450_v25 }
 0x364   : > { %2952 = vtanh.f32 %v4839_v9  ;;  %v1597_v56 = vand.u32 2147483647, %v1450_v25  ;;  %vm1593_vm10 = vweird.f32 %v1450_v25  ;;  %v5608_v2 = vmov %v5570_v52 }
 0x365   : > { %v1600_v14 = vor.u32 1.1754944e-38, %v1599_v7  ;;  %v5610_v42 = vmov %v5585_v16  ;;  %v5611_v60 = vmov %v5568_v50  ;;  %v5612_v47 = vmov %v5555_v36 }
 0x366   : > { %vm1598_vm12 = vcmp.eq.f32.partialorder %v1597_v56, 8.507059e+37  ;;  %v5614_v23 = vmov %v5594_v58  ;;  %v5616_v40 = vmov %v1662_v26  ;;  %v5619_v15 = vmov (%p5071_p3), %v5583_v61 }
 0x367   :  { %v5620_v7 = vmov (%p5071_p3), %v5560_v59  ;;  %v5623_v21 = vmov (%p5071_p3), %v5587_v30  ;;  %v5624_v51 = vmov (%p5071_p3), %v5570_v52  ;;  %v5626_v33 = vmov (%p5071_p3), %v5585_v16 }
 0x368   : > { %v2949_v11 = vpop.eup %2948  ;;  %v5627_v20 = vmov (%p5071_p3), %v5568_v50  ;;  %v5628_v24 = vmov (%p5071_p3), %v5555_v36  ;;  %v5629_v63 = vmov (%p5071_p3), %v5594_v58 }
 0x369   : > { %v1291_v6 = vmul.f32 %v2949_v11, %v1266_v55  ;;  %v2951_v29 = vpop.eup %2950  ;;  %v5607_v55 = vmov %v5587_v30 }
 0x36a   : > { %v1589_v27 = vmul.f32 %v2951_v29, %v1450_v25  ;;  %vm1594_vm7 = vweird.f32 %v2951_v29  ;;  %v2953_v8 = vpop.eup %2952  ;;  %v5613_v25 = vmov %v5596_v44 }
 0x36b   : > { %v1300_v39 = vsel %vm4755_vm8, %v1291_v6, %v5598_v4   ;;  %vm1595_vm11 = vmor %vm1593_vm10, %vm1594_vm7  ;;  %v5602_v4 = vmov %v5588_v43  ;;  %v5618_v6 = vmov (%p5071_p3), %v5588_v43  ;;  %v5622_v43 = vmov (%p5071_p3), %v5595_v17 }
 0x36c   : > { %v1590_v62 = vsub.f32 1.0, %v1589_v27  ;;  %v5601_v27 = vmov %v1304_v46  ;;  %v5605_v18 = vmov %v1300_v39  ;;  %v5621_v48 = vmov (%p5071_p3), %v1300_v39 }
 0x36e   : > { %v1591_v28 = vmul.f32 %v2951_v29, %v1590_v62 }
 0x370   : > { %v1592_v37 = vadd.f32 %v2951_v29, %v1591_v28  ;;  %v5617_v28 = vmov (%p5071_p3), %v1304_v46  ;;  %v5625_v46 = vmov (%p5071_p3), %v5589_v38 }
 0x372   : > { %v1596_v13 = vsel %vm1595_vm11, %v2951_v29, %v1592_v37 }
 0x373   : > { %v1601_v41 = vsel %vm1598_vm12, %v1600_v14, %v1596_v13  ;;  %v5609_v13 = vmov %v5589_v38  ;;  %876 = sbr.rel (!%p5071_p3) target bundleno = 591 (0x24f), region = 76 }
 0x374   : > { %v1654_v32 = vmul.f32 %v2953_v8, %v1601_v41  ;;  %v5603_v8 = vmov %v5583_v61 }
 0x376   : > { %v1663_v0 = vsel %vm4707_vm14, %v1654_v32, %v5599_v53  }
 0x377   : > { %v5615_v62 = vmov %v1663_v0  ;;  %v5630_v11 = vmov (%p5071_p3), %v1663_v0  ;;  %v5631_v0 = vmov (%p5071_p3), %v1662_v26 }
 0x378 PF:  { %v1677_v36 = vpack.c.bf16 %v3224_v43, %v3224_v43  ;;  %v1678_v59 = vpack.c.bf16 %v3220_v48, %v3220_v48  ;;  %v1675_v9 = vpack.c.bf16 %v3232_v51, %v3232_v51  ;;  %v1676_v50 = vpack.c.bf16 %v3228_v21, %v3228_v21  ;;  %1990 = vst [vmem:[%s5342_s8] sm:$0xff] %v3248_v24  ;;  %v5632_v34 = vld [vmem:[#allocation28_spill] sm:$0xff]  ;;  %v5633_v17 = vld [vmem:[#allocation30_spill] sm:$0xff]  ;;  %v5648_v29 = vld [vmem:[#allocation11_spill] sm:$0xff]  ;;  %s2247_s6 = sadd.s32 4294967295, %s5340_s0  ;;  %v3264_v0 = vphi %v5469_v0, %v5631_v0   ;;  %v3260_v11 = vphi %v5468_v11, %v5630_v11   ;;  %v3256_v63 = vphi %v5467_v63, %v5629_v63   ;;  %v3252_v44 = vphi %v5466_v44, %v5596_v44   ;;  %v3248_v24 = vphi %v5465_v24, %v5628_v24   ;;  %v3244_v20 = vphi %v5464_v20, %v5627_v20   ;;  %v3240_v33 = vphi %v5463_v33, %v5626_v33   ;;  %v3236_v46 = vphi %v5462_v46, %v5625_v46   ;;  %v3232_v51 = vphi %v4176_v51, %v5624_v51   ;;  %v3228_v21 = vphi %v4174_v21, %v5623_v21   ;;  %v3224_v43 = vphi %v4172_v43, %v5622_v43   ;;  %v3220_v48 = vphi %v4170_v48, %v5621_v48   ;;  %v3216_v7 = vphi %v4168_v7, %v5620_v7   ;;  %v3212_v15 = vphi %v4166_v15, %v5619_v15   ;;  %v3208_v6 = vphi %v4164_v6, %v5618_v6   ;;  %v3204_v28 = vphi %v4162_v28, %v5617_v28  }
 0x379   :  { %v1673_v52 = vpack.c.bf16 %v3256_v63, %v3256_v63  ;;  %v1674_v61 = vpack.c.bf16 %v3252_v44, %v3252_v44  ;;  %1991 = vst [vmem:[%s5342_s8 + $0x8] sm:$0xff] %v3244_v20  ;;  %v1671_v43 = vpack.c.bf16 %v3264_v0, %v3264_v0  ;;  %v1672_v20 = vpack.c.bf16 %v3260_v11, %v3260_v11  ;;  %v5634_v2 = vld [vmem:[#allocation36_spill] sm:$0xff]  ;;  %v5635_v12 = vld [vmem:[#allocation38_spill] sm:$0xff]  ;;  %v5650_v8 = vld [vmem:[#allocation7_spill] sm:$0xff] }
 0x37a   :  { %v1697_v16 = vunpack.c.l.b16 %v1677_v36  ;;  %v1698_v30 = vunpack.c.l.b16 %v1678_v59  ;;  %v1695_v38 = vunpack.c.l.b16 %v1675_v9  ;;  %v1696_v58 = vunpack.c.l.b16 %v1676_v50  ;;  %1992 = vst [vmem:[%s5342_s8 + $0x10] sm:$0xff] %v3240_v33  ;;  %v5636_v19 = vld [vmem:[#allocation54_spill] sm:$0xff]  ;;  %v5637_v10 = vld [vmem:[#allocation56_spill] sm:$0xff]  ;;  %v5651_v32 = vld [vmem:[#allocation27_spill] sm:$0xff] }
 0x37b   :  { %1993 = vst [vmem:[%s5342_s8 + $0x18] sm:$0xff] %v3236_v46  ;;  %v1685_v47 = vunpack.c.l.b16 %v1673_v52  ;;  %v1686_v54 = vunpack.c.l.b16 %v1674_v61  ;;  %v1683_v21 = vunpack.c.l.b16 %v1671_v43  ;;  %v1684_v63 = vunpack.c.l.b16 %v1672_v20  ;;  %v5638_v44 = vld [vmem:[#allocation46_spill] sm:$0xff]  ;;  %v5639_v1 = vld [vmem:[#allocation48_spill] sm:$0xff] }
 0x37c   :  { %v1700_v48 = vpack.c.b16 %v1698_v30, %v1697_v16  ;;  %v1699_v51 = vpack.c.b16 %v1696_v58, %v1695_v38  ;;  %v2251_v49 = vor.u32 %v5633_v17, %v5632_v34  ;;  %v2259_v31 = vor.u32 %v5635_v12, %v5634_v2  ;;  %v5640_v45 = vld [vmem:[#allocation32_spill] sm:$0xff]  ;;  %v5641_v57 = vld [vmem:[#allocation34_spill] sm:$0xff]  ;;  %v5652_v30 = vld [vmem:[#allocation15_spill] sm:$0xff] }
 0x37d   :  { %v1688_v24 = vpack.c.b16 %v1686_v54, %v1685_v47  ;;  %v1687_v23 = vpack.c.b16 %v1684_v63, %v1683_v21  ;;  %vm1743_vm1 = vcmask 523264   ;;  %v2275_v42 = vor.u32 %v5637_v10, %v5636_v19  ;;  %v5642_v18 = vld [vmem:[#allocation40_spill] sm:$0xff]  ;;  %v5643_v5 = vld [vmem:[#allocation42_spill] sm:$0xff] }
 0x37e   :  { %1772 = vmatpush.bf16.msra.mxu0 %v1700_v48  ;;  %2473 = vmatpush.bf16.msra.mxu1 %v1700_v48  ;;  %v2267_v3 = vor.u32 %v5639_v1, %v5638_v44  ;;  %v2255_v22 = vor.u32 %v5641_v57, %v5640_v45  ;;  %v2263_v46 = vor.u32 %v5643_v5, %v5642_v18  ;;  %v5644_v25 = vld [vmem:[#allocation58_spill] sm:$0xff]  ;;  %v5645_v60 = vld [vmem:[#allocation60_spill] sm:$0xff]  ;;  %v1981_v61 = vstv %s2247_s6 }
 0x37f   :  { %2475 = vmatpush.bf16.msra.mxu3 %v1700_v48  ;;  %2474 = vmatpush.bf16.msra.mxu2 %v1700_v48  ;;  %v2279_v33 = vor.u32 %v5645_v60, %v5644_v25  ;;  %v5646_v26 = vld [vmem:[#allocation50_spill] sm:$0xff]  ;;  %v5647_v40 = vld [vmem:[#allocation52_spill] sm:$0xff]  ;;  %vm1982_vm14 = vcmp.gt.s32.totalorder %v5652_v30, %v1981_v61  ;;  %v5656_v21 = vmov 0  }
 0x380   :  { %v2271_v35 = vor.u32 %v5647_v40, %v5646_v26  ;;  %v5649_v39 = vld [vmem:[#allocation8_spill] sm:$0xff]  ;;  %v5653_v58 = vld [vmem:[#allocation62_spill] sm:$0xff]  ;;  %v1983_v63 = vsel %vm1982_vm14, 1, %v5656_v21 }
 0x381   :  { %v5654_v47 = vld [vmem:[#allocation14_spill] sm:$0xff]  ;;  %v1984_v10 = vperm.slane %v1983_v63, 0  ;;  %v5657_v25 = vld [vmem:[#allocation12_spill] sm:$0xff] }
 0x382   :  { %1773 = vmatpush.bf16.msra.mxu0 %v1699_v51  ;;  %2476 = vmatpush.bf16.msra.mxu1 %v1699_v51  ;;  %v5655_v20 = vld [vmem:[#allocation26_spill] sm:$0xff] }
 0x383   :  { %2478 = vmatpush.bf16.msra.mxu3 %v1699_v51  ;;  %2477 = vmatpush.bf16.msra.mxu2 %v1699_v51  ;;  %vm5253_vm0 = vcmp.eq.s32.totalorder %v1984_v10, 1 }
 0x386   :  { %1774 = vmatpush.bf16.msra.mxu0 %v1688_v24  ;;  %2479 = vmatpush.bf16.msra.mxu1 %v1688_v24 }
 0x387   :  { %2481 = vmatpush.bf16.msra.mxu3 %v1688_v24  ;;  %2480 = vmatpush.bf16.msra.mxu2 %v1688_v24 }
 0x38a   :  { %1775 = vmatpush.bf16.msra.mxu0 %v1687_v23  ;;  %2482 = vmatpush.bf16.msra.mxu1 %v1687_v23 }
 0x38b   :  { %2484 = vmatpush.bf16.msra.mxu3 %v1687_v23  ;;  %2483 = vmatpush.bf16.msra.mxu2 %v1687_v23 }
 0x38d   :  { %2280 = vmatmul.msk.bf16.vlgmr.msra.gmra.mxu0 %vm1743_vm1, %v2251_v49  ;;  %2282 = vmatmul.msk.bf16.vlgmr.msra.gmra.mxu1 %vm1743_vm1, %v2259_v31 }
 0x38e   :  { %2286 = vmatmul.msk.bf16.vlgmr.msra.gmra.mxu3 %vm1743_vm1, %v2275_v42  ;;  %2284 = vmatmul.msk.bf16.vlgmr.msra.gmra.mxu2 %vm1743_vm1, %v2267_v3 }
 0x39d   :  { %2281 = vmatmul.msk.bf16.gmra.mxu0 %vm1743_vm1, %v2255_v22  ;;  %2283 = vmatmul.msk.bf16.gmra.mxu1 %vm1743_vm1, %v2263_v46 }
 0x39e   :  { %2287 = vmatmul.msk.bf16.gmra.mxu3 %vm1743_vm1, %v2279_v33  ;;  %2285 = vmatmul.msk.bf16.gmra.mxu2 %vm1743_vm1, %v2271_v35 }
 0x40a   :  { %v1777_v11 = vpop.f32.mrf.mxu0  ;;  %v1787_v55 = vpop.f32.mrf.mxu1 }
 0x40b   :  { %v1778_v4 = vadd.f32 %v1777_v11, %v5648_v29  ;;  %v1788_v27 = vadd.f32 %v1787_v55, %v5649_v39 }
 0x40d   :  { %v2288_v62 = vmul.f32 -1.442695, %v1778_v4  ;;  %v2292_v56 = vmul.f32 -1.442695, %v1788_v27 }
 0x40f   :  { %2954 = vpow2.f32 %v2288_v62 }
 0x410   :  { %2956 = vpow2.f32 %v2292_v56 }
 0x411   :  { %v1797_v37 = vpop.f32.mrf.mxu2  ;;  %v1803_v59 = vpop.f32.mrf.mxu3 }
 0x412   :  { %v1779_v14 = vpop.f32.mrf.mxu0  ;;  %v1789_v13 = vpop.f32.mrf.mxu1  ;;  %v1804_v48 = vadd.f32 %v1803_v59, %v5653_v58  ;;  %v5664_v37 = vld [vmem:[#allocation13_spill] sm:$0xff] }
 0x413   :  { %v1780_v41 = vadd.f32 %v1779_v14, %v5650_v8  ;;  %v1790_v53 = vadd.f32 %v1789_v13, %v5651_v32 }
 0x415   :  { %v2955_v0 = vpop.eup %2954  ;;  %v2289_v36 = vmul.f32 -1.442695, %v1780_v41  ;;  %v2293_v52 = vmul.f32 -1.442695, %v1790_v53 }
 0x416   :  { %v2957_v9 = vpop.eup %2956  ;;  %v1837_v50 = vadd.f32 1.0, %v2955_v0 }
 0x417   :  { %v5234_v16 = vadd.f32 1.0, %v2957_v9  ;;  %2958 = vpow2.f32 %v2289_v36  ;;  %v5665_v9 = vld [vmem:[#allocation9_spill] sm:$0xff] }
 0x418   :  { %2960 = vrcp.f32 %v1837_v50  ;;  %v1854_v19 = vand.u32 2147483647, %v1837_v50  ;;  %v1856_v45 = vand.u32 2147483648, %v1837_v50  ;;  %vm1850_vm8 = vweird.f32 %v1837_v50 }
 0x419   :  { %2962 = vrcp.f32 %v5234_v16  ;;  %v1798_v38 = vpop.f32.mrf.mxu2  ;;  %v1805_v42 = vpop.f32.mrf.mxu3  ;;  %v1916_v3 = vand.u32 2147483648, %v5234_v16  ;;  %v1914_v18 = vand.u32 2147483647, %v5234_v16  ;;  %vm1910_vm13 = vweird.f32 %v5234_v16 }
 0x41a   :  { %2964 = vpow2.f32 %v2293_v52  ;;  %v1782_v43 = vpop.f32.mrf.mxu0  ;;  %v1792_v51 = vpop.f32.mrf.mxu1  ;;  %v1806_v60 = vadd.f32 %v1805_v42, %v5657_v25  ;;  %vm5257_vm2 = vcmp.eq.f32.partialorder %v1854_v19, 8.507059e+37  ;;  %v1857_v29 = vor.u32 1.1754944e-38, %v1856_v45 }
 0x41b   :  { %v1783_v54 = vadd.f32 %v1782_v43, %v5654_v47  ;;  %v1793_v24 = vadd.f32 %v1792_v51, %v5655_v20  ;;  %2966 = vtanh.f32 %v1804_v48  ;;  %v1917_v27 = vor.u32 1.1754944e-38, %v1916_v3 }
 0x41c   :  { %vm5261_vm4 = vcmp.eq.f32.partialorder %v1914_v18, 8.507059e+37 }
 0x41d   :  { %v2959_v23 = vpop.eup %2958  ;;  %v2290_v34 = vmul.f32 -1.442695, %v1783_v54  ;;  %v2294_v17 = vmul.f32 -1.442695, %v1793_v24 }
 0x41e   :  { %v2961_v49 = vpop.eup %2960  ;;  %v5242_v2 = vadd.f32 1.0, %v2959_v23 }
 0x41f   :  { %v2963_v12 = vpop.eup %2962  ;;  %v1846_v31 = vmul.f32 %v2961_v49, %v1837_v50  ;;  %2968 = vpow2.f32 %v2290_v34  ;;  %vm1851_vm15 = vweird.f32 %v2961_v49 }
 0x420   :  { %v2965_v44 = vpop.eup %2964  ;;  %v1906_v1 = vmul.f32 %v2963_v12, %v5234_v16  ;;  %2970 = vrcp.f32 %v5242_v2  ;;  %vm1911_vm3 = vweird.f32 %v2963_v12  ;;  %vm1852_vm5 = vmor %vm1850_vm8, %vm1851_vm15  ;;  %v1869_v32 = vand.u32 2147483647, %v5242_v2 }
 0x421   :  { %v1847_v57 = vsub.f32 1.0, %v1846_v31  ;;  %v5247_v22 = vadd.f32 1.0, %v2965_v44  ;;  %2972 = vpow2.f32 %v2294_v17  ;;  %v1800_v5 = vpop.f32.mrf.mxu2  ;;  %v2967_v35 = vpop.eup %2966  ;;  %vm1912_vm6 = vmor %vm1910_vm13, %vm1911_vm3  ;;  %v1871_v54 = vand.u32 2147483648, %v5242_v2 }
 0x422   :  { %v1907_v46 = vsub.f32 1.0, %v1906_v1  ;;  %v1784_v33 = vpop.f32.mrf.mxu0  ;;  %v1794_v4 = vpop.f32.mrf.mxu1  ;;  %vm1865_vm7 = vweird.f32 %v5242_v2  ;;  %vm1870_vm1 = vcmp.eq.f32.partialorder %v1869_v32, 8.507059e+37 }
 0x423   :  { %2974 = vrcp.f32 %v5247_v22  ;;  %v1848_v26 = vmul.f32 %v2961_v49, %v1847_v57  ;;  %v1785_v14 = vadd.f32 %v1784_v33, %v5664_v37  ;;  %v1795_v52 = vadd.f32 %v1794_v4, %v5665_v9  ;;  %v1808_v63 = vpop.f32.mrf.mxu3 }
 0x424   :  { %v1908_v11 = vmul.f32 %v2963_v12, %v1907_v46  ;;  %2976 = vtanh.f32 %v1806_v60  ;;  %v1931_v20 = vand.u32 2147483648, %v5247_v22  ;;  %vm1925_vm10 = vweird.f32 %v5247_v22 }
 0x425   :  { %v2969_v39 = vpop.eup %2968  ;;  %v1849_v62 = vadd.f32 %v2961_v49, %v1848_v26  ;;  %v2291_v59 = vmul.f32 -1.442695, %v1785_v14  ;;  %v2295_v21 = vmul.f32 -1.442695, %v1795_v52  ;;  %v1929_v19 = vand.u32 2147483647, %v5247_v22 }
 0x426   :  { %v2971_v13 = vpop.eup %2970  ;;  %v1909_v8 = vadd.f32 %v2963_v12, %v1908_v11  ;;  %v5267_v41 = vadd.f32 1.0, %v2969_v39  ;;  %v1872_v1 = vor.u32 1.1754944e-38, %v1871_v54 }
 0x427   :  { %v2973_v53 = vpop.eup %2972  ;;  %v1861_v0 = vmul.f32 %v2971_v13, %v5242_v2  ;;  %v1853_v36 = vsel %vm1852_vm5, %v2961_v49, %v1849_v62  ;;  %vm1866_vm9 = vweird.f32 %v2971_v13  ;;  %v5666_v49 = vld [vmem:[#allocation65_spill] sm:$0xff]  ;;  %v1932_v2 = vor.u32 1.1754944e-38, %v1931_v20 }
 0x428   :  { %v1858_v50 = vsel %vm5257_vm2, %v1857_v29, %v1853_v36  ;;  %v1913_v61 = vsel %vm1912_vm6, %v2963_v12, %v1909_v8  ;;  %2978 = vrcp.f32 %v5267_v41  ;;  %v5278_v30 = vadd.f32 1.0, %v2973_v53  ;;  %vm1867_vm11 = vmor %vm1865_vm7, %vm1866_vm9 }
 0x429   :  { %v2975_v38 = vpop.eup %2974  ;;  %v1862_v58 = vsub.f32 1.0, %v1861_v0  ;;  %v1918_v48 = vsel %vm5261_vm4, %v1917_v27, %v1913_v61  ;;  %v1973_v43 = vmul.f32 %v2967_v35, %v1858_v50  ;;  %2980 = vpow2.f32 %v2291_v59  ;;  %v1801_v16 = vpop.f32.mrf.mxu2 }
 0x42a   :  { %v1921_v51 = vmul.f32 %v2975_v38, %v5247_v22  ;;  %v1969_v47 = vmul.f32 %v3216_v7, %v1918_v48  ;;  %2982 = vrcp.f32 %v5278_v30  ;;  %v2977_v23 = vpop.eup %2976  ;;  %v1809_v12 = vadd.f32 %v1808_v63, %v5666_v49 }
 0x42b   :  { %v1863_v24 = vmul.f32 %v2971_v13, %v1862_v58  ;;  %2984 = vpow2.f32 %v2295_v21  ;;  %vm1926_vm12 = vweird.f32 %v2975_v38  ;;  %vm1930_vm8 = vcmp.eq.f32.partialorder %v1929_v19, 8.507059e+37  ;;  %v1810_v36 = vpop.f32.mrf.mxu3  ;;  %v5667_v58 = vld [vmem:[#allocation64_spill] sm:$0xff] }
 0x42c   :  { %v1922_v34 = vsub.f32 1.0, %v1921_v51  ;;  %v1977_v17 = vadd.f32 %v1973_v43, %v1969_v47  ;;  %2986 = vtanh.f32 %v1809_v12  ;;  %vm1927_vm14 = vmor %vm1925_vm10, %vm1926_vm12  ;;  %v1884_v33 = vand.u32 2147483647, %v5267_v41 }
 0x42d   :  { %v1864_v31 = vadd.f32 %v2971_v13, %v1863_v24  ;;  %v1886_v11 = vand.u32 2147483648, %v5267_v41  ;;  %v1946_v27 = vand.u32 2147483648, %v5278_v30  ;;  %vm1880_vm15 = vweird.f32 %v5267_v41 }
 0x42e   :  { %v2979_v10 = vpop.eup %2978  ;;  %v1923_v42 = vmul.f32 %v2975_v38, %v1922_v34  ;;  %v1986_v44 = vsel %vm5253_vm0, %v1977_v17, %v3216_v7  ;;  %v1944_v14 = vand.u32 2147483647, %v5278_v30  ;;  %vm1940_vm4 = vweird.f32 %v5278_v30 }
 0x42f   :  { %v2981_v3 = vpop.eup %2980  ;;  %1994 = vst [vmem:[%s5342_s8 + $0x20] sm:$0xff] %v1986_v44  ;;  %v1876_v45 = vmul.f32 %v2979_v10, %v5267_v41  ;;  %v1868_v57 = vsel %vm1867_vm11, %v2971_v13, %v1864_v31  ;;  %vm1881_vm13 = vweird.f32 %v2979_v10  ;;  %v1887_v32 = vor.u32 1.1754944e-38, %v1886_v11 }
 0x430   :  { %v2983_v18 = vpop.eup %2982  ;;  %v1873_v5 = vsel %vm1870_vm1, %v1872_v1, %v1868_v57  ;;  %v1924_v46 = vadd.f32 %v2975_v38, %v1923_v42  ;;  %v5299_v25 = vadd.f32 1.0, %v2981_v3  ;;  %vm1882_vm3 = vmor %vm1880_vm15, %vm1881_vm13  ;;  %vm1885_vm5 = vcmp.eq.f32.partialorder %v1884_v33, 8.507059e+37 }
 0x431   :  { %v1877_v7 = vsub.f32 1.0, %v1876_v45  ;;  %v1936_v60 = vmul.f32 %v2983_v18, %v5278_v30  ;;  %v1974_v35 = vmul.f32 %v2977_v23, %v1873_v5  ;;  %v2985_v55 = vpop.eup %2984  ;;  %vm1941_vm2 = vweird.f32 %v2983_v18 }
 0x432   :  { %v1928_v26 = vsel %vm1927_vm14, %v2975_v38, %v1924_v46  ;;  %2988 = vrcp.f32 %v5299_v25  ;;  %v1844_v22 = vadd.f32 1.0, %v2985_v55  ;;  %v2987_v13 = vpop.eup %2986  ;;  %v1947_v9 = vor.u32 1.1754944e-38, %v1946_v27  ;;  %vm1942_vm6 = vmor %vm1940_vm4, %vm1941_vm2 }
 0x433   :  { %v1937_v29 = vsub.f32 1.0, %v1936_v60  ;;  %v1933_v4 = vsel %vm1930_vm8, %v1932_v2, %v1928_v26  ;;  %v1878_v39 = vmul.f32 %v2979_v10, %v1877_v7  ;;  %vm1945_vm9 = vcmp.eq.f32.partialorder %v1944_v14, 8.507059e+37 }
 0x434   :  { %v1970_v62 = vmul.f32 %v3212_v15, %v1933_v4  ;;  %2990 = vrcp.f32 %v1844_v22  ;;  %v1811_v48 = vadd.f32 %v1810_v36, %v5667_v58  ;;  %v1901_v47 = vand.u32 2147483648, %v5299_v25 }
 0x435   :  { %v1938_v56 = vmul.f32 %v2983_v18, %v1937_v29  ;;  %v1879_v37 = vadd.f32 %v2979_v10, %v1878_v39  ;;  %vm1895_vm10 = vweird.f32 %v5299_v25  ;;  %v1961_v34 = vand.u32 2147483648, %v1844_v22 }
 0x436   :  { %v1978_v8 = vadd.f32 %v1974_v35, %v1970_v62  ;;  %2992 = vtanh.f32 %v1811_v48  ;;  %v1902_v17 = vor.u32 1.1754944e-38, %v1901_v47  ;;  %v1959_v31 = vand.u32 2147483647, %v1844_v22 }
 0x437   :  { %v1883_v53 = vsel %vm1882_vm3, %v2979_v10, %v1879_v37  ;;  %v1939_v0 = vadd.f32 %v2983_v18, %v1938_v56  ;;  %vm1955_vm14 = vweird.f32 %v1844_v22 }
 0x438   :  { %v2989_v59 = vpop.eup %2988  ;;  %v1987_v41 = vsel %vm5253_vm0, %v1978_v8, %v3212_v15  ;;  %v1888_v52 = vsel %vm1885_vm5, %v1887_v32, %v1883_v53  ;;  %v1899_v15 = vand.u32 2147483647, %v5299_v25  ;;  %vm1960_vm13 = vcmp.eq.f32.partialorder %v1959_v31, 8.507059e+37 }
 0x439   :  { %1995 = vst [vmem:[%s5342_s8 + $0x28] sm:$0xff] %v1987_v41  ;;  %v1891_v50 = vmul.f32 %v2989_v59, %v5299_v25  ;;  %v1943_v61 = vsel %vm1942_vm6, %v2983_v18, %v1939_v0  ;;  %v1975_v30 = vmul.f32 %v2987_v13, %v1888_v52  ;;  %vm1896_vm7 = vweird.f32 %v2989_v59 }
 0x43a   :  { %v1948_v38 = vsel %vm1945_vm9, %v1947_v9, %v1943_v61  ;;  %v2991_v51 = vpop.eup %2990  ;;  %vm1897_vm11 = vmor %vm1895_vm10, %vm1896_vm7  ;;  %vm1900_vm12 = vcmp.eq.f32.partialorder %v1899_v15, 8.507059e+37 }
 0x43b   :  { %v1892_v43 = vsub.f32 1.0, %v1891_v50  ;;  %v1971_v16 = vmul.f32 %v3208_v6, %v1948_v38  ;;  %v1951_v54 = vmul.f32 %v2991_v51, %v1844_v22  ;;  %vm1956_vm1 = vweird.f32 %v2991_v51 }
 0x43c   :  { %v2993_v42 = vpop.eup %2992  ;;  %vm1957_vm8 = vmor %vm1955_vm14, %vm1956_vm1 }
 0x43d   :  { %v1979_v20 = vadd.f32 %v1975_v30, %v1971_v16  ;;  %v1893_v24 = vmul.f32 %v2989_v59, %v1892_v43  ;;  %v1952_v21 = vsub.f32 1.0, %v1951_v54 }
 0x43f   :  { %v1988_v63 = vsel %vm5253_vm0, %v1979_v20, %v3208_v6  ;;  %v1894_v23 = vadd.f32 %v2989_v59, %v1893_v24  ;;  %v1953_v49 = vmul.f32 %v2991_v51, %v1952_v21  ;;  %v1962_v6 = vor.u32 1.1754944e-38, %v1961_v34 }
 0x440   :  { %1996 = vst [vmem:[%s5342_s8 + $0x30] sm:$0xff] %v1988_v63 }
 0x441   :  { %v1898_v12 = vsel %vm1897_vm11, %v2989_v59, %v1894_v23  ;;  %v1954_v10 = vadd.f32 %v2991_v51, %v1953_v49 }
 0x442   :  { %v1903_v19 = vsel %vm1900_vm12, %v1902_v17, %v1898_v12 }
 0x443   :  { %v1958_v44 = vsel %vm1957_vm8, %v2991_v51, %v1954_v10  ;;  %v1976_v1 = vmul.f32 %v2993_v42, %v1903_v19 }
 0x444   :  { %v1963_v3 = vsel %vm1960_vm13, %v1962_v6, %v1958_v44 }
 0x445   :  { %v1972_v2 = vmul.f32 %v3204_v28, %v1963_v3 }
 0x447   :  { %v1980_v45 = vadd.f32 %v1976_v1, %v1972_v2 }
 0x449   :  { %v1989_v57 = vsel %vm5253_vm0, %v1980_v45, %v3204_v28 }
 0x44a   :  { %1997 = vst [vmem:[%s5342_s8 + $0x38] sm:$0xff] %v1989_v57 }

</bundles_post_ra>
